<compile_context>
chip_gen: v7x
topology: tpu7x:2x2x1
jax: 0.10.0
libtpu: 0.0.40
codegen_flags: <defaults>
</compile_context>

<pallas_src>
import functools

import jax
import jax.numpy as jnp
from jax.experimental import pallas as pl
from jax.experimental.pallas import tpu as pltpu


_TILE_M = 512  # multiple of 128 and 256 -> MXU-aligned on v5e/v6e/v7x


# ----------------------------- Pallas kernels -----------------------------

def _matmul_bias_kernel(x_ref, w_ref, b_ref, o_ref, *, relu):
    acc = jnp.dot(x_ref[...], w_ref[...], preferred_element_type=jnp.float32)
    acc = acc + b_ref[...]
    if relu:
        acc = jnp.maximum(acc, 0.0)
    o_ref[...] = acc.astype(o_ref.dtype)


def matmul_bias(x, w, b, relu=False):
    """x:[M,K] @ w:[K,N] + b:[N] (optionally ReLU), tiled over M."""
    M, K = x.shape
    _, N = w.shape
    tm = M if M <= _TILE_M else _TILE_M
    return pl.pallas_call(
        functools.partial(_matmul_bias_kernel, relu=relu),
        out_shape=jax.ShapeDtypeStruct((M, N), jnp.float32),
        grid=(pl.cdiv(M, tm),),
        in_specs=[pl.BlockSpec((tm, K), lambda i: (i, 0)),
                  pl.BlockSpec((K, N), lambda i: (0, 0)),   # weight resident
                  pl.BlockSpec((1, N), lambda i: (0, 0))],  # bias resident
        out_specs=pl.BlockSpec((tm, N), lambda i: (i, 0)),
        compiler_params=pltpu.CompilerParams(
            dimension_semantics=("parallel",)),
    )(x, w, b.reshape(1, N))


def _maxpool_kernel(y_ref, o_ref, *, c):
    # y_ref block: [TR, 2, Wp, 2*C]  (rows = n*Hp+hp; dims = dh, wp, dw*C+c)
    y = y_ref[...]
    m = jnp.maximum(y[:, 0], y[:, 1])                 # max over dh -> [TR,Wp,2C]
    o_ref[...] = jnp.maximum(m[..., :c], m[..., c:])  # max over dw -> [TR,Wp,C]


def maxpool2x2(y):
    """y: [N, H, W, C] f32 -> max_pool2d(y, 2): [N, H//2, W//2, C]."""
    N, H, W, C = y.shape
    Hp, Wp = H // 2, W // 2
    R = N * Hp
    y4 = y.reshape(R, 2, Wp, 2 * C)                   # contiguous reshape, free
    tr = R if R <= 256 else 256
    out = pl.pallas_call(
        functools.partial(_maxpool_kernel, c=C),
        out_shape=jax.ShapeDtypeStruct((R, Wp, C), jnp.float32),
        grid=(pl.cdiv(R, tr),),
        in_specs=[pl.BlockSpec((tr, 2, Wp, 2 * C), lambda i: (i, 0, 0, 0))],
        out_specs=pl.BlockSpec((tr, Wp, C), lambda i: (i, 0, 0)),
        compiler_params=pltpu.CompilerParams(
            dimension_semantics=("parallel",)),
    )(y4)
    return out.reshape(N, Hp, Wp, C)


def _mlp_head_kernel(x_ref, w1_ref, b1_ref, w2_ref, b2_ref, o_ref):
    # fc1 + ReLU + fc2 + log_softmax fused in one kernel.
    h = jnp.dot(x_ref[...], w1_ref[...], preferred_element_type=jnp.float32)
    h = jnp.maximum(h + b1_ref[...], 0.0)
    # TODO(synk): F.dropout between fc1 and fc2 is identity in eval mode only.
    z = jnp.dot(h.astype(w2_ref.dtype), w2_ref[...],
                preferred_element_type=jnp.float32)
    z = z + b2_ref[...]
    m = jnp.max(z, axis=-1, keepdims=True)
    lse = jnp.log(jnp.sum(jnp.exp(z - m), axis=-1, keepdims=True)) + m
    o_ref[...] = (z - lse).astype(o_ref.dtype)


def mlp_head(x, w1, b1, w2, b2):
    """Fused fc1(320->50)+ReLU+fc2(50->10)+log_softmax, tiled over rows."""
    M, K1 = x.shape
    _, N1 = w1.shape
    _, N2 = w2.shape
    tm = M if M <= _TILE_M else _TILE_M
    return pl.pallas_call(
        _mlp_head_kernel,
        out_shape=jax.ShapeDtypeStruct((M, N2), jnp.float32),
        grid=(pl.cdiv(M, tm),),
        in_specs=[pl.BlockSpec((tm, K1), lambda i: (i, 0)),
                  pl.BlockSpec((K1, N1), lambda i: (0, 0)),
                  pl.BlockSpec((1, N1), lambda i: (0, 0)),
                  pl.BlockSpec((N1, N2), lambda i: (0, 0)),
                  pl.BlockSpec((1, N2), lambda i: (0, 0))],
        out_specs=pl.BlockSpec((tm, N2), lambda i: (i, 0)),
        compiler_params=pltpu.CompilerParams(
            dimension_semantics=("parallel",)),
    )(x, w1, b1.reshape(1, N1), w2, b2.reshape(1, N2))


# ------------------------------- JAX glue ---------------------------------

def _im2col_nhwc(x, k):
    """x: [N, H, W, C] -> patches [N*Ho*Wo, k*k*C], inner order (kh, kw, c)."""
    N, H, W, C = x.shape
    Ho, Wo = H - k + 1, W - k + 1
    cols = []
    for ki in range(k):
        for kj in range(k):
            cols.append(x[:, ki:ki + Ho, kj:kj + Wo, :])   # [N, Ho, Wo, C]
    p = jnp.stack(cols, axis=3)                            # [N, Ho, Wo, k*k, C]
    return p.reshape(N * Ho * Wo, k * k * C), (N, Ho, Wo)


def conv2d_nhwc(x, w, b, *, relu):
    """x: [N, H, W, C] NHWC; w: [OC, IC, k, k] (PyTorch layout). Returns NHWC."""
    OC, IC, k, _ = w.shape
    patches, (N, Ho, Wo) = _im2col_nhwc(x.astype(jnp.bfloat16), k)
    # Reorder weight to (kh, kw, ic, oc) to match the patch inner order.
    w2 = jnp.transpose(w, (2, 3, 1, 0)).reshape(k * k * IC, OC)
    out = matmul_bias(patches, w2.astype(jnp.bfloat16), b, relu=relu)
    return out.reshape(N, Ho, Wo, OC)


def lenet_forward(x, params):
    """x: [N, 1, 28, 28] float32 (NCHW, as in PyTorch). Returns [N, 10] log-probs."""
    xh = jnp.transpose(x, (0, 2, 3, 1))                    # NHWC (C=1, trivial)
    y = conv2d_nhwc(xh, params["conv1_w"], params["conv1_b"], relu=True)
    y = maxpool2x2(y)                                      # [N,12,12,10]
    # TODO(synk): Dropout2d after conv2 is identity in eval mode; training-mode
    # channel masks are not implemented here.
    y = conv2d_nhwc(y, params["conv2_w"], params["conv2_b"], relu=True)
    y = maxpool2x2(y)                                      # [N,4,4,20]
    N = y.shape[0]
    feats = y.reshape(N, 4 * 4 * 20)                       # (h, w, c) flatten
    # Permute fc1 columns from PyTorch's (c,h,w) flatten to our (h,w,c) flatten
    # so the activation never needs an NHWC->NCHW transpose.
    w1 = (params["fc1_w"].reshape(50, 20, 4, 4)
          .transpose(0, 2, 3, 1).reshape(50, 320).T)       # [320, 50]
    out = mlp_head(feats.astype(jnp.bfloat16),
                   w1.astype(jnp.bfloat16), params["fc1_b"],
                   params["fc2_w"].T.astype(jnp.bfloat16), params["fc2_b"])
    return out                                             # [N, 10] f32


def init_params(key):
    """Deterministic PyTorch-style uniform(-1/sqrt(fan_in), 1/sqrt(fan_in)) init."""
    ks = jax.random.split(key, 8)

    def u(k, shape, fan_in):
        bound = 1.0 / jnp.sqrt(jnp.float32(fan_in))
        return jax.random.uniform(k, shape, jnp.float32, -bound, bound)

    return {
        "conv1_w": u(ks[0], (10, 1, 5, 5), 25),
        "conv1_b": u(ks[1], (10,), 25),
        "conv2_w": u(ks[2], (20, 10, 5, 5), 250),
        "conv2_b": u(ks[3], (20,), 250),
        "fc1_w":   u(ks[4], (50, 320), 320),
        "fc1_b":   u(ks[5], (50,), 320),
        "fc2_w":   u(ks[6], (10, 50), 50),
        "fc2_b":   u(ks[7], (10,), 50),
    }


if __name__ == "__main__":
    key = jax.random.PRNGKey(0)
    pkey, xkey = jax.random.split(key)
    params = init_params(pkey)
    # fc1 expects 320 = 20*4*4 features, which implies 1x28x28 inputs
    # (MNIST-style). Use a small batch of 2.
    x = jax.random.normal(xkey, (2, 1, 28, 28), dtype=jnp.float32)
    out = jax.jit(lenet_forward)(x, params)
    out = jax.block_until_ready(out)
    assert out.shape == (2, 10)
    # log_softmax rows must exponentiate-sum to 1
    assert bool(jnp.allclose(jnp.sum(jnp.exp(out), axis=1), 1.0, atol=1e-4))
    print("KERNEL_OK")
</pallas_src>

<mosaic_0001>
module attributes {stable_mosaic.version = 11 : i64} {
  func.func @_matmul_bias_kernel(%arg0: i32, %arg1: memref<512x25xbf16, #tpu.memory_space<vmem>>, %arg2: memref<25x10xbf16, #tpu.memory_space<vmem>>, %arg3: memref<1x10xf32, #tpu.memory_space<vmem>>, %arg4: memref<512x10xf32, #tpu.memory_space<vmem>>) attributes {dimension_semantics = [#tpu.dimension_semantics<parallel>], iteration_bounds = array<i64: 3>, scalar_prefetch = 0 : i64, scratch_operands = 0 : i64, tpu.core_type = #tpu.core_type<tc>, window_params = [{transform_indices = @transform_0, window_bounds = array<i64: 512, 25>}, {pipeline_mode = #tpu.pipeline_mode<synchronous>, transform_indices = @transform_1, window_bounds = array<i64: 25, 10>}, {pipeline_mode = #tpu.pipeline_mode<synchronous>, transform_indices = @transform_2, window_bounds = array<i64: 1, 10>}, {transform_indices = @transform_3, window_bounds = array<i64: 512, 10>}]} {
    %c0 = arith.constant 0 : index
    %c0_0 = arith.constant 0 : index
    %0 = vector.load %arg1[%c0, %c0_0] : memref<512x25xbf16, #tpu.memory_space<vmem>>, vector<512x25xbf16>
    %c0_1 = arith.constant 0 : index
    %c0_2 = arith.constant 0 : index
    %1 = vector.load %arg2[%c0_1, %c0_2] : memref<25x10xbf16, #tpu.memory_space<vmem>>, vector<25x10xbf16>
    %cst = arith.constant dense<0.000000e+00> : vector<512x10xf32>
    %2 = tpu.matmul %0, %1, %cst {dimension_numbers = #tpu.dot_dimension_numbers<[1], [0], [0], [1], [0, 0, 1, 1], [], []>} : vector<512x25xbf16>, vector<25x10xbf16>, vector<512x10xf32> -> vector<512x10xf32>
    %c0_3 = arith.constant 0 : index
    %c0_4 = arith.constant 0 : index
    %3 = vector.load %arg3[%c0_3, %c0_4] : memref<1x10xf32, #tpu.memory_space<vmem>>, vector<1x10xf32>
    %4 = vector.broadcast %3 : vector<1x10xf32> to vector<512x10xf32>
    %5 = arith.addf %2, %4 : vector<512x10xf32>
    %cst_5 = arith.constant 0.000000e+00 : f32
    %6 = vector.broadcast %cst_5 : f32 to vector<512x10xf32>
    %7 = arith.maximumf %5, %6 : vector<512x10xf32>
    %c0_6 = arith.constant 0 : index
    %c0_7 = arith.constant 0 : index
    %8 = vector.load %arg4[%c0_6, %c0_7] : memref<512x10xf32, #tpu.memory_space<vmem>>, vector<512x10xf32>
    tpu.vector_store %arg4[%c0_6, %c0_7], %7 {strides = array<i32>} : memref<512x10xf32, #tpu.memory_space<vmem>>, vector<512x10xf32>,
    return
  }
  func.func @transform_0(%arg0: i32) -> (i32, i32) {
    %c0_i32 = arith.constant 0 : i32
    %c0_i32_0 = arith.constant 0 : i32
    return %arg0, %c0_i32 : i32, i32
  }
  func.func @transform_1(%arg0: i32) -> (i32, i32) {
    %c0_i32 = arith.constant 0 : i32
    %c0_i32_0 = arith.constant 0 : i32
    %c0_i32_1 = arith.constant 0 : i32
    return %c0_i32, %c0_i32_0 : i32, i32
  }
  func.func @transform_2(%arg0: i32) -> (i32, i32) {
    %c0_i32 = arith.constant 0 : i32
    %c0_i32_0 = arith.constant 0 : i32
    %c0_i32_1 = arith.constant 0 : i32
    return %c0_i32, %c0_i32_0 : i32, i32
  }
  func.func @transform_3(%arg0: i32) -> (i32, i32) {
    %c0_i32 = arith.constant 0 : i32
    %c0_i32_0 = arith.constant 0 : i32
    return %arg0, %c0_i32 : i32, i32
  }
}

module attributes {stable_mosaic.version = 11 : i64} {
  func.func @_maxpool_kernel(%arg0: i32, %arg1: memref<24x2x12x20xf32, #tpu.memory_space<vmem>>, %arg2: memref<24x12x10xf32, #tpu.memory_space<vmem>>) attributes {dimension_semantics = [#tpu.dimension_semantics<parallel>], iteration_bounds = array<i64: 1>, scalar_prefetch = 0 : i64, scratch_operands = 0 : i64, tpu.core_type = #tpu.core_type<tc>, window_params = [{transform_indices = @transform_0, window_bounds = array<i64: 24, 2, 12, 20>}, {transform_indices = @transform_1, window_bounds = array<i64: 24, 12, 10>}]} {
    %c0 = arith.constant 0 : index
    %c0_0 = arith.constant 0 : index
    %c0_1 = arith.constant 0 : index
    %c0_2 = arith.constant 0 : index
    %0 = vector.load %arg1[%c0, %c0_0, %c0_1, %c0_2] : memref<24x2x12x20xf32, #tpu.memory_space<vmem>>, vector<24x2x12x20xf32>
    %1 = vector.extract_strided_slice %0 {offsets = [0, 0, 0, 0], sizes = [24, 1, 12, 20], strides = [1, 1, 1, 1]} : vector<24x2x12x20xf32> to vector<24x1x12x20xf32>
    %2 = vector.shape_cast %1 : vector<24x1x12x20xf32> to vector<24x12x20xf32>
    %3 = vector.extract_strided_slice %0 {offsets = [0, 1, 0, 0], sizes = [24, 1, 12, 20], strides = [1, 1, 1, 1]} : vector<24x2x12x20xf32> to vector<24x1x12x20xf32>
    %4 = vector.shape_cast %3 : vector<24x1x12x20xf32> to vector<24x12x20xf32>
    %5 = arith.maximumf %2, %4 : vector<24x12x20xf32>
    %6 = vector.extract_strided_slice %5 {offsets = [0, 0, 0], sizes = [24, 12, 10], strides = [1, 1, 1]} : vector<24x12x20xf32> to vector<24x12x10xf32>
    %7 = vector.extract_strided_slice %5 {offsets = [0, 0, 10], sizes = [24, 12, 10], strides = [1, 1, 1]} : vector<24x12x20xf32> to vector<24x12x10xf32>
    %8 = arith.maximumf %6, %7 : vector<24x12x10xf32>
    %c0_3 = arith.constant 0 : index
    %c0_4 = arith.constant 0 : index
    %c0_5 = arith.constant 0 : index
    %9 = vector.load %arg2[%c0_3, %c0_4, %c0_5] : memref<24x12x10xf32, #tpu.memory_space<vmem>>, vector<24x12x10xf32>
    tpu.vector_store %arg2[%c0_3, %c0_4, %c0_5], %8 {strides = array<i32>} : memref<24x12x10xf32, #tpu.memory_space<vmem>>, vector<24x12x10xf32>,
    return
  }
  func.func @transform_0(%arg0: i32) -> (i32, i32, i32, i32) {
    %c0_i32 = arith.constant 0 : i32
    %c0_i32_0 = arith.constant 0 : i32
    %c0_i32_1 = arith.constant 0 : i32
    %c0_i32_2 = arith.constant 0 : i32
    return %arg0, %c0_i32, %c0_i32_0, %c0_i32_1 : i32, i32, i32, i32
  }
  func.func @transform_1(%arg0: i32) -> (i32, i32, i32) {
    %c0_i32 = arith.constant 0 : i32
    %c0_i32_0 = arith.constant 0 : i32
    %c0_i32_1 = arith.constant 0 : i32
    return %arg0, %c0_i32, %c0_i32_0 : i32, i32, i32
  }
}

module attributes {stable_mosaic.version = 11 : i64} {
  func.func @_matmul_bias_kernel(%arg0: i32, %arg1: memref<128x250xbf16, #tpu.memory_space<vmem>>, %arg2: memref<250x20xbf16, #tpu.memory_space<vmem>>, %arg3: memref<1x20xf32, #tpu.memory_space<vmem>>, %arg4: memref<128x20xf32, #tpu.memory_space<vmem>>) attributes {dimension_semantics = [#tpu.dimension_semantics<parallel>], iteration_bounds = array<i64: 1>, scalar_prefetch = 0 : i64, scratch_operands = 0 : i64, tpu.core_type = #tpu.core_type<tc>, window_params = [{transform_indices = @transform_0, window_bounds = array<i64: 128, 250>}, {pipeline_mode = #tpu.pipeline_mode<synchronous>, transform_indices = @transform_1, window_bounds = array<i64: 250, 20>}, {pipeline_mode = #tpu.pipeline_mode<synchronous>, transform_indices = @transform_2, window_bounds = array<i64: 1, 20>}, {transform_indices = @transform_3, window_bounds = array<i64: 128, 20>}]} {
    %c0 = arith.constant 0 : index
    %c0_0 = arith.constant 0 : index
    %0 = vector.load %arg1[%c0, %c0_0] : memref<128x250xbf16, #tpu.memory_space<vmem>>, vector<128x250xbf16>
    %c0_1 = arith.constant 0 : index
    %c0_2 = arith.constant 0 : index
    %1 = vector.load %arg2[%c0_1, %c0_2] : memref<250x20xbf16, #tpu.memory_space<vmem>>, vector<250x20xbf16>
    %cst = arith.constant dense<0.000000e+00> : vector<128x20xf32>
    %2 = tpu.matmul %0, %1, %cst {dimension_numbers = #tpu.dot_dimension_numbers<[1], [0], [0], [1], [0, 0, 1, 1], [], []>} : vector<128x250xbf16>, vector<250x20xbf16>, vector<128x20xf32> -> vector<128x20xf32>
    %c0_3 = arith.constant 0 : index
    %c0_4 = arith.constant 0 : index
    %3 = vector.load %arg3[%c0_3, %c0_4] : memref<1x20xf32, #tpu.memory_space<vmem>>, vector<1x20xf32>
    %4 = vector.broadcast %3 : vector<1x20xf32> to vector<128x20xf32>
    %5 = arith.addf %2, %4 : vector<128x20xf32>
    %cst_5 = arith.constant 0.000000e+00 : f32
    %6 = vector.broadcast %cst_5 : f32 to vector<128x20xf32>
    %7 = arith.maximumf %5, %6 : vector<128x20xf32>
    %c0_6 = arith.constant 0 : index
    %c0_7 = arith.constant 0 : index
    %8 = vector.load %arg4[%c0_6, %c0_7] : memref<128x20xf32, #tpu.memory_space<vmem>>, vector<128x20xf32>
    tpu.vector_store %arg4[%c0_6, %c0_7], %7 {strides = array<i32>} : memref<128x20xf32, #tpu.memory_space<vmem>>, vector<128x20xf32>,
    return
  }
  func.func @transform_0(%arg0: i32) -> (i32, i32) {
    %c0_i32 = arith.constant 0 : i32
    %c0_i32_0 = arith.constant 0 : i32
    return %arg0, %c0_i32 : i32, i32
  }
  func.func @transform_1(%arg0: i32) -> (i32, i32) {
    %c0_i32 = arith.constant 0 : i32
    %c0_i32_0 = arith.constant 0 : i32
    %c0_i32_1 = arith.constant 0 : i32
    return %c0_i32, %c0_i32_0 : i32, i32
  }
  func.func @transform_2(%arg0: i32) -> (i32, i32) {
    %c0_i32 = arith.constant 0 : i32
    %c0_i32_0 = arith.constant 0 : i32
    %c0_i32_1 = arith.constant 0 : i32
    return %c0_i32, %c0_i32_0 : i32, i32
  }
  func.func @transform_3(%arg0: i32) -> (i32, i32) {
    %c0_i32 = arith.constant 0 : i32
    %c0_i32_0 = arith.constant 0 : i32
    return %arg0, %c0_i32 : i32, i32
  }
}

module attributes {stable_mosaic.version = 11 : i64} {
  func.func @_maxpool_kernel(%arg0: i32, %arg1: memref<8x2x4x40xf32, #tpu.memory_space<vmem>>, %arg2: memref<8x4x20xf32, #tpu.memory_space<vmem>>) attributes {dimension_semantics = [#tpu.dimension_semantics<parallel>], iteration_bounds = array<i64: 1>, scalar_prefetch = 0 : i64, scratch_operands = 0 : i64, tpu.core_type = #tpu.core_type<tc>, window_params = [{transform_indices = @transform_0, window_bounds = array<i64: 8, 2, 4, 40>}, {transform_indices = @transform_1, window_bounds = array<i64: 8, 4, 20>}]} {
    %c0 = arith.constant 0 : index
    %c0_0 = arith.constant 0 : index
    %c0_1 = arith.constant 0 : index
    %c0_2 = arith.constant 0 : index
    %0 = vector.load %arg1[%c0, %c0_0, %c0_1, %c0_2] : memref<8x2x4x40xf32, #tpu.memory_space<vmem>>, vector<8x2x4x40xf32>
    %1 = vector.extract_strided_slice %0 {offsets = [0, 0, 0, 0], sizes = [8, 1, 4, 40], strides = [1, 1, 1, 1]} : vector<8x2x4x40xf32> to vector<8x1x4x40xf32>
    %2 = vector.shape_cast %1 : vector<8x1x4x40xf32> to vector<8x4x40xf32>
    %3 = vector.extract_strided_slice %0 {offsets = [0, 1, 0, 0], sizes = [8, 1, 4, 40], strides = [1, 1, 1, 1]} : vector<8x2x4x40xf32> to vector<8x1x4x40xf32>
    %4 = vector.shape_cast %3 : vector<8x1x4x40xf32> to vector<8x4x40xf32>
    %5 = arith.maximumf %2, %4 : vector<8x4x40xf32>
    %6 = vector.extract_strided_slice %5 {offsets = [0, 0, 0], sizes = [8, 4, 20], strides = [1, 1, 1]} : vector<8x4x40xf32> to vector<8x4x20xf32>
    %7 = vector.extract_strided_slice %5 {offsets = [0, 0, 20], sizes = [8, 4, 20], strides = [1, 1, 1]} : vector<8x4x40xf32> to vector<8x4x20xf32>
    %8 = arith.maximumf %6, %7 : vector<8x4x20xf32>
    %c0_3 = arith.constant 0 : index
    %c0_4 = arith.constant 0 : index
    %c0_5 = arith.constant 0 : index
    %9 = vector.load %arg2[%c0_3, %c0_4, %c0_5] : memref<8x4x20xf32, #tpu.memory_space<vmem>>, vector<8x4x20xf32>
    tpu.vector_store %arg2[%c0_3, %c0_4, %c0_5], %8 {strides = array<i32>} : memref<8x4x20xf32, #tpu.memory_space<vmem>>, vector<8x4x20xf32>,
    return
  }
  func.func @transform_0(%arg0: i32) -> (i32, i32, i32, i32) {
    %c0_i32 = arith.constant 0 : i32
    %c0_i32_0 = arith.constant 0 : i32
    %c0_i32_1 = arith.constant 0 : i32
    %c0_i32_2 = arith.constant 0 : i32
    return %arg0, %c0_i32, %c0_i32_0, %c0_i32_1 : i32, i32, i32, i32
  }
  func.func @transform_1(%arg0: i32) -> (i32, i32, i32) {
    %c0_i32 = arith.constant 0 : i32
    %c0_i32_0 = arith.constant 0 : i32
    %c0_i32_1 = arith.constant 0 : i32
    return %arg0, %c0_i32, %c0_i32_0 : i32, i32, i32
  }
}

module attributes {stable_mosaic.version = 11 : i64} {
  func.func @_mlp_head_kernel(%arg0: i32, %arg1: memref<2x320xbf16, #tpu.memory_space<vmem>>, %arg2: memref<320x50xbf16, #tpu.memory_space<vmem>>, %arg3: memref<1x50xf32, #tpu.memory_space<vmem>>, %arg4: memref<50x10xbf16, #tpu.memory_space<vmem>>, %arg5: memref<1x10xf32, #tpu.memory_space<vmem>>, %arg6: memref<2x10xf32, #tpu.memory_space<vmem>>) attributes {dimension_semantics = [#tpu.dimension_semantics<parallel>], iteration_bounds = array<i64: 1>, scalar_prefetch = 0 : i64, scratch_operands = 0 : i64, tpu.core_type = #tpu.core_type<tc>, window_params = [{transform_indices = @transform_0, window_bounds = array<i64: 2, 320>}, {pipeline_mode = #tpu.pipeline_mode<synchronous>, transform_indices = @transform_1, window_bounds = array<i64: 320, 50>}, {pipeline_mode = #tpu.pipeline_mode<synchronous>, transform_indices = @transform_2, window_bounds = array<i64: 1, 50>}, {pipeline_mode = #tpu.pipeline_mode<synchronous>, transform_indices = @transform_3, window_bounds = array<i64: 50, 10>}, {pipeline_mode = #tpu.pipeline_mode<synchronous>, transform_indices = @transform_4, window_bounds = array<i64: 1, 10>}, {transform_indices = @transform_5, window_bounds = array<i64: 2, 10>}]} {
    %c0 = arith.constant 0 : index
    %c0_0 = arith.constant 0 : index
    %0 = vector.load %arg1[%c0, %c0_0] : memref<2x320xbf16, #tpu.memory_space<vmem>>, vector<2x320xbf16>
    %c0_1 = arith.constant 0 : index
    %c0_2 = arith.constant 0 : index
    %1 = vector.load %arg2[%c0_1, %c0_2] : memref<320x50xbf16, #tpu.memory_space<vmem>>, vector<320x50xbf16>
    %cst = arith.constant dense<0.000000e+00> : vector<2x50xf32>
    %2 = tpu.matmul %0, %1, %cst {dimension_numbers = #tpu.dot_dimension_numbers<[1], [0], [0], [1], [0, 0, 1, 1], [], []>} : vector<2x320xbf16>, vector<320x50xbf16>, vector<2x50xf32> -> vector<2x50xf32>
    %c0_3 = arith.constant 0 : index
    %c0_4 = arith.constant 0 : index
    %3 = vector.load %arg3[%c0_3, %c0_4] : memref<1x50xf32, #tpu.memory_space<vmem>>, vector<1x50xf32>
    %4 = vector.broadcast %3 : vector<1x50xf32> to vector<2x50xf32>
    %5 = arith.addf %2, %4 : vector<2x50xf32>
    %cst_5 = arith.constant 0.000000e+00 : f32
    %6 = vector.broadcast %cst_5 : f32 to vector<2x50xf32>
    %7 = arith.maximumf %5, %6 : vector<2x50xf32>
    %8 = arith.truncf %7 : vector<2x50xf32> to vector<2x50xbf16>
    %c0_6 = arith.constant 0 : index
    %c0_7 = arith.constant 0 : index
    %9 = vector.load %arg4[%c0_6, %c0_7] : memref<50x10xbf16, #tpu.memory_space<vmem>>, vector<50x10xbf16>
    %cst_8 = arith.constant dense<0.000000e+00> : vector<2x10xf32>
    %10 = tpu.matmul %8, %9, %cst_8 {dimension_numbers = #tpu.dot_dimension_numbers<[1], [0], [0], [1], [0, 0, 1, 1], [], []>} : vector<2x50xbf16>, vector<50x10xbf16>, vector<2x10xf32> -> vector<2x10xf32>
    %c0_9 = arith.constant 0 : index
    %c0_10 = arith.constant 0 : index
    %11 = vector.load %arg5[%c0_9, %c0_10] : memref<1x10xf32, #tpu.memory_space<vmem>>, vector<1x10xf32>
    %12 = vector.broadcast %11 : vector<1x10xf32> to vector<2x10xf32>
    %13 = arith.addf %10, %12 : vector<2x10xf32>
    %cst_11 = arith.constant dense<0xFF800000> : vector<2xf32>
    %14 = vector.multi_reduction <maximumf>, %13, %cst_11 [1] : vector<2x10xf32> to vector<2xf32>
    %15 = vector.shape_cast %14 : vector<2xf32> to vector<2x1xf32>
    %16 = vector.broadcast %15 : vector<2x1xf32> to vector<2x10xf32>
    %17 = arith.subf %13, %16 : vector<2x10xf32>
    %18 = math.exp %17 : vector<2x10xf32>
    %cst_12 = arith.constant dense<0.000000e+00> : vector<2xf32>
    %19 = vector.multi_reduction <add>, %18, %cst_12 [1] : vector<2x10xf32> to vector<2xf32>
    %20 = vector.shape_cast %19 : vector<2xf32> to vector<2x1xf32>
    %21 = math.log %20 : vector<2x1xf32>
    %22 = arith.addf %21, %15 : vector<2x1xf32>
    %23 = vector.broadcast %22 : vector<2x1xf32> to vector<2x10xf32>
    %24 = arith.subf %13, %23 : vector<2x10xf32>
    %c0_13 = arith.constant 0 : index
    %c0_14 = arith.constant 0 : index
    %25 = vector.load %arg6[%c0_13, %c0_14] : memref<2x10xf32, #tpu.memory_space<vmem>>, vector<2x10xf32>
    tpu.vector_store %arg6[%c0_13, %c0_14], %24 {strides = array<i32>} : memref<2x10xf32, #tpu.memory_space<vmem>>, vector<2x10xf32>,
    return
  }
  func.func @transform_0(%arg0: i32) -> (i32, i32) {
    %c0_i32 = arith.constant 0 : i32
    %c0_i32_0 = arith.constant 0 : i32
    return %arg0, %c0_i32 : i32, i32
  }
  func.func @transform_1(%arg0: i32) -> (i32, i32) {
    %c0_i32 = arith.constant 0 : i32
    %c0_i32_0 = arith.constant 0 : i32
    %c0_i32_1 = arith.constant 0 : i32
    return %c0_i32, %c0_i32_0 : i32, i32
  }
  func.func @transform_2(%arg0: i32) -> (i32, i32) {
    %c0_i32 = arith.constant 0 : i32
    %c0_i32_0 = arith.constant 0 : i32
    %c0_i32_1 = arith.constant 0 : i32
    return %c0_i32, %c0_i32_0 : i32, i32
  }
  func.func @transform_3(%arg0: i32) -> (i32, i32) {
    %c0_i32 = arith.constant 0 : i32
    %c0_i32_0 = arith.constant 0 : i32
    %c0_i32_1 = arith.constant 0 : i32
    return %c0_i32, %c0_i32_0 : i32, i32
  }
  func.func @transform_4(%arg0: i32) -> (i32, i32) {
    %c0_i32 = arith.constant 0 : i32
    %c0_i32_0 = arith.constant 0 : i32
    %c0_i32_1 = arith.constant 0 : i32
    return %c0_i32, %c0_i32_0 : i32, i32
  }
  func.func @transform_5(%arg0: i32) -> (i32, i32) {
    %c0_i32 = arith.constant 0 : i32
    %c0_i32_0 = arith.constant 0 : i32
    return %arg0, %c0_i32 : i32, i32
  }
}

</mosaic_0001>

<bundles_post_ra>
// kernel: lenet_forward.6
= control target key start
LH: loop header
LB: loop body
LE: loop exit
PB: predicated region body
PF: predicated region fallthrough
CT: control target
= control target key end

     0   :  { %s447_s22 = smov 118   ;;  %vm392_vm0 = vcmask 80896   ;;  %vm394_vm1 = vcmask 76800   ;;  %s1178_s0 = inlined_call_operand.vmem [shape: f32[24,2,12,20], index: 0, kind: input, shape index: {}]   ;;  %s1179_s1 = inlined_call_operand.vmem [shape: f32[24,12,10], index: 1, kind: output, shape index: {}]  }
   0x1   :  { %v12_v0 = vld [vmem:[%s1178_s0 + $0x20] sm:$0xff]  ;;  %v14_v1 = vld [vmem:[%s1178_s0 + $0x30] sm:$0xff]  ;;  %v13_v5 = vld [vmem:[%s1178_s0 + $0x28] sm:$0xf] }
   0x2   :  { %v8_v2 = vld [vmem:[%s1178_s0] sm:$0xff]  ;;  %v467_v3 = vmax.f32 %v12_v0, %v14_v1  ;;  %v10_v4 = vld [vmem:[%s1178_s0 + $0x10] sm:$0xff]  ;;  %v15_v6 = vld [vmem:[%s1178_s0 + $0x38] sm:$0xf] }
   0x3   :  { %v478_v7 = vmax.f32 %v8_v2, %v10_v4  ;;  %v9_v8 = vld [vmem:[%s1178_s0 + $0x8] sm:$0xf]  ;;  %v11_v9 = vld [vmem:[%s1178_s0 + $0x18] sm:$0xf]  ;;  %v488_v10 = vmax.f32 %v13_v5, %v15_v6  ;;  %v16_v14 = vld [vmem:[%s1178_s0 + $0x40] sm:$0xff] }
   0x4   :  { %204 = vrot.lane.b32.xlu1 %v467_v3, %s447_s22  ;;  %v492_v11 = vmax.f32 %v9_v8, %v11_v9  ;;  %v17_v12 = vld [vmem:[%s1178_s0 + $0x48] sm:$0xf]  ;;  %v19_v13 = vld [vmem:[%s1178_s0 + $0x58] sm:$0xf]  ;;  %v18_v15 = vld [vmem:[%s1178_s0 + $0x50] sm:$0xff] }
   0x5   :  { %200 = vrot.lane.b32.xlu0 %v478_v7, %s447_s22  ;;  %v508_v16 = vmax.f32 %v17_v12, %v19_v13  ;;  %v512_v17 = vmax.f32 %v16_v14, %v18_v15  ;;  %v21_v18 = vld [vmem:[%s1178_s0 + $0x68] sm:$0xf]  ;;  %v23_v19 = vld [vmem:[%s1178_s0 + $0x78] sm:$0xf]  ;;  %v20_v20 = vld [vmem:[%s1178_s0 + $0x60] sm:$0xff] }
   0x6   :  { %v22_v21 = vld [vmem:[%s1178_s0 + $0x70] sm:$0xff]  ;;  %v528_v22 = vmax.f32 %v21_v18, %v23_v19  ;;  %v25_v24 = vld [vmem:[%s1178_s0 + $0x88] sm:$0xf]  ;;  %v27_v25 = vld [vmem:[%s1178_s0 + $0x98] sm:$0xf] }
   0x7   :  { %v532_v23 = vmax.f32 %v20_v20, %v22_v21  ;;  %v24_v26 = vld [vmem:[%s1178_s0 + $0x80] sm:$0xff]  ;;  %v26_v27 = vld [vmem:[%s1178_s0 + $0x90] sm:$0xff]  ;;  %v548_v28 = vmax.f32 %v25_v24, %v27_v25  ;;  %v29_v30 = vld [vmem:[%s1178_s0 + $0xa8] sm:$0xf] }
   0x8   :  { %206 = vrot.lane.b32.xlu1 %v488_v10, %s447_s22  ;;  %v552_v29 = vmax.f32 %v24_v26, %v26_v27  ;;  %v31_v31 = vld [vmem:[%s1178_s0 + $0xb8] sm:$0xf]  ;;  %v28_v32 = vld [vmem:[%s1178_s0 + $0xa0] sm:$0xff]  ;;  %v30_v33 = vld [vmem:[%s1178_s0 + $0xb0] sm:$0xff] }
   0x9   :  { %202 = vrot.lane.b32.xlu0 %v492_v11, %s447_s22  ;;  %v568_v34 = vmax.f32 %v29_v30, %v31_v31  ;;  %v572_v35 = vmax.f32 %v28_v32, %v30_v33  ;;  %v33_v36 = vld [vmem:[%s1178_s0 + $0xc8] sm:$0xf]  ;;  %v35_v37 = vld [vmem:[%s1178_s0 + $0xd8] sm:$0xf]  ;;  %v32_v38 = vld [vmem:[%s1178_s0 + $0xc0] sm:$0xff] }
   0xa   :  { %v34_v39 = vld [vmem:[%s1178_s0 + $0xd0] sm:$0xff]  ;;  %v588_v40 = vmax.f32 %v33_v36, %v35_v37  ;;  %v37_v42 = vld [vmem:[%s1178_s0 + $0xe8] sm:$0xf]  ;;  %v39_v43 = vld [vmem:[%s1178_s0 + $0xf8] sm:$0xf] }
   0xb   :  { %v592_v41 = vmax.f32 %v32_v38, %v34_v39  ;;  %v36_v44 = vld [vmem:[%s1178_s0 + $0xe0] sm:$0xff]  ;;  %v38_v45 = vld [vmem:[%s1178_s0 + $0xf0] sm:$0xff]  ;;  %v608_v46 = vmax.f32 %v37_v42, %v39_v43  ;;  %v41_v48 = vld [vmem:[%s1178_s0 + $0x108] sm:$0xf] }
   0xc   :  { %210 = vrot.lane.b32.xlu1 %v508_v16, %s447_s22  ;;  %v612_v47 = vmax.f32 %v36_v44, %v38_v45  ;;  %v43_v49 = vld [vmem:[%s1178_s0 + $0x118] sm:$0xf]  ;;  %v40_v50 = vld [vmem:[%s1178_s0 + $0x100] sm:$0xff]  ;;  %v42_v51 = vld [vmem:[%s1178_s0 + $0x110] sm:$0xff] }
   0xd   :  { %208 = vrot.lane.b32.xlu0 %v512_v17, %s447_s22  ;;  %v628_v52 = vmax.f32 %v41_v48, %v43_v49  ;;  %v632_v53 = vmax.f32 %v40_v50, %v42_v51  ;;  %v45_v54 = vld [vmem:[%s1178_s0 + $0x128] sm:$0xf]  ;;  %v47_v55 = vld [vmem:[%s1178_s0 + $0x138] sm:$0xf]  ;;  %v44_v56 = vld [vmem:[%s1178_s0 + $0x120] sm:$0xff] }
   0xe   :  { %v46_v57 = vld [vmem:[%s1178_s0 + $0x130] sm:$0xff]  ;;  %v648_v58 = vmax.f32 %v45_v54, %v47_v55  ;;  %v49_v60 = vld [vmem:[%s1178_s0 + $0x148] sm:$0xf]  ;;  %v51_v61 = vld [vmem:[%s1178_s0 + $0x158] sm:$0xf] }
   0xf   :  { %v652_v59 = vmax.f32 %v44_v56, %v46_v57  ;;  %v48_v62 = vld [vmem:[%s1178_s0 + $0x140] sm:$0xff]  ;;  %v50_v63 = vld [vmem:[%s1178_s0 + $0x150] sm:$0xff]  ;;  %v668_v0 = vmax.f32 %v49_v60, %v51_v61  ;;  %v53_v2 = vld [vmem:[%s1178_s0 + $0x168] sm:$0xf] }
  0x10   :  { %214 = vrot.lane.b32.xlu1 %v528_v22, %s447_s22  ;;  %v672_v1 = vmax.f32 %v48_v62, %v50_v63  ;;  %v55_v4 = vld [vmem:[%s1178_s0 + $0x178] sm:$0xf]  ;;  %v52_v5 = vld [vmem:[%s1178_s0 + $0x160] sm:$0xff]  ;;  %v54_v6 = vld [vmem:[%s1178_s0 + $0x170] sm:$0xff] }
  0x11   :  { %212 = vrot.lane.b32.xlu0 %v532_v23, %s447_s22  ;;  %v688_v8 = vmax.f32 %v53_v2, %v55_v4  ;;  %v692_v9 = vmax.f32 %v52_v5, %v54_v6  ;;  %v57_v12 = vld [vmem:[%s1178_s0 + $0x188] sm:$0xf]  ;;  %v59_v13 = vld [vmem:[%s1178_s0 + $0x198] sm:$0xf]  ;;  %v56_v14 = vld [vmem:[%s1178_s0 + $0x180] sm:$0xff] }
  0x12   :  { %v58_v15 = vld [vmem:[%s1178_s0 + $0x190] sm:$0xff]  ;;  %v708_v18 = vmax.f32 %v57_v12, %v59_v13  ;;  %v61_v20 = vld [vmem:[%s1178_s0 + $0x1a8] sm:$0xf]  ;;  %v63_v21 = vld [vmem:[%s1178_s0 + $0x1b8] sm:$0xf] }
  0x13   :  { %v712_v19 = vmax.f32 %v56_v14, %v58_v15  ;;  %v60_v24 = vld [vmem:[%s1178_s0 + $0x1a0] sm:$0xff]  ;;  %v62_v25 = vld [vmem:[%s1178_s0 + $0x1b0] sm:$0xff]  ;;  %v728_v26 = vmax.f32 %v61_v20, %v63_v21  ;;  %v65_v30 = vld [vmem:[%s1178_s0 + $0x1c8] sm:$0xf] }
  0x14   :  { %218 = vrot.lane.b32.xlu1 %v548_v28, %s447_s22  ;;  %v732_v27 = vmax.f32 %v60_v24, %v62_v25  ;;  %v67_v31 = vld [vmem:[%s1178_s0 + $0x1d8] sm:$0xf]  ;;  %v64_v32 = vld [vmem:[%s1178_s0 + $0x1c0] sm:$0xff]  ;;  %v66_v33 = vld [vmem:[%s1178_s0 + $0x1d0] sm:$0xff] }
  0x15   :  { %216 = vrot.lane.b32.xlu0 %v552_v29, %s447_s22  ;;  %v748_v36 = vmax.f32 %v65_v30, %v67_v31  ;;  %v752_v37 = vmax.f32 %v64_v32, %v66_v33  ;;  %v69_v38 = vld [vmem:[%s1178_s0 + $0x1e8] sm:$0xf]  ;;  %v71_v39 = vld [vmem:[%s1178_s0 + $0x1f8] sm:$0xf]  ;;  %v68_v42 = vld [vmem:[%s1178_s0 + $0x1e0] sm:$0xff] }
  0x16   :  { %v70_v43 = vld [vmem:[%s1178_s0 + $0x1f0] sm:$0xff]  ;;  %v768_v44 = vmax.f32 %v69_v38, %v71_v39  ;;  %v73_v48 = vld [vmem:[%s1178_s0 + $0x208] sm:$0xf]  ;;  %v75_v49 = vld [vmem:[%s1178_s0 + $0x218] sm:$0xf] }
  0x17   :  { %v772_v45 = vmax.f32 %v68_v42, %v70_v43  ;;  %v72_v50 = vld [vmem:[%s1178_s0 + $0x200] sm:$0xff]  ;;  %v74_v51 = vld [vmem:[%s1178_s0 + $0x210] sm:$0xff]  ;;  %v788_v54 = vmax.f32 %v73_v48, %v75_v49  ;;  %v77_v56 = vld [vmem:[%s1178_s0 + $0x228] sm:$0xf] }
  0x18   :  { %222 = vrot.lane.b32.xlu1 %v568_v34, %s447_s22  ;;  %v792_v55 = vmax.f32 %v72_v50, %v74_v51  ;;  %v79_v57 = vld [vmem:[%s1178_s0 + $0x238] sm:$0xf]  ;;  %v76_v60 = vld [vmem:[%s1178_s0 + $0x220] sm:$0xff]  ;;  %v78_v61 = vld [vmem:[%s1178_s0 + $0x230] sm:$0xff] }
  0x19   :  { %220 = vrot.lane.b32.xlu0 %v572_v35, %s447_s22  ;;  %v808_v62 = vmax.f32 %v77_v56, %v79_v57  ;;  %v812_v63 = vmax.f32 %v76_v60, %v78_v61  ;;  %v81_v2 = vld [vmem:[%s1178_s0 + $0x248] sm:$0xf]  ;;  %v83_v4 = vld [vmem:[%s1178_s0 + $0x258] sm:$0xf]  ;;  %v80_v5 = vld [vmem:[%s1178_s0 + $0x240] sm:$0xff] }
  0x1a   :  { %v82_v6 = vld [vmem:[%s1178_s0 + $0x250] sm:$0xff]  ;;  %v828_v12 = vmax.f32 %v81_v2, %v83_v4  ;;  %v85_v14 = vld [vmem:[%s1178_s0 + $0x268] sm:$0xf]  ;;  %v87_v15 = vld [vmem:[%s1178_s0 + $0x278] sm:$0xf] }
  0x1b   :  { %v832_v13 = vmax.f32 %v80_v5, %v82_v6  ;;  %v84_v20 = vld [vmem:[%s1178_s0 + $0x260] sm:$0xff]  ;;  %v86_v21 = vld [vmem:[%s1178_s0 + $0x270] sm:$0xff]  ;;  %v848_v24 = vmax.f32 %v85_v14, %v87_v15  ;;  %v89_v30 = vld [vmem:[%s1178_s0 + $0x288] sm:$0xf] }
  0x1c   :  { %226 = vrot.lane.b32.xlu1 %v588_v40, %s447_s22  ;;  %v852_v25 = vmax.f32 %v84_v20, %v86_v21  ;;  %v91_v31 = vld [vmem:[%s1178_s0 + $0x298] sm:$0xf]  ;;  %v88_v32 = vld [vmem:[%s1178_s0 + $0x280] sm:$0xff]  ;;  %v90_v33 = vld [vmem:[%s1178_s0 + $0x290] sm:$0xff] }
  0x1d   :  { %224 = vrot.lane.b32.xlu0 %v592_v41, %s447_s22  ;;  %v868_v38 = vmax.f32 %v89_v30, %v91_v31  ;;  %v872_v39 = vmax.f32 %v88_v32, %v90_v33  ;;  %v93_v42 = vld [vmem:[%s1178_s0 + $0x2a8] sm:$0xf]  ;;  %v95_v43 = vld [vmem:[%s1178_s0 + $0x2b8] sm:$0xf]  ;;  %v92_v48 = vld [vmem:[%s1178_s0 + $0x2a0] sm:$0xff] }
  0x1e   :  { %v94_v49 = vld [vmem:[%s1178_s0 + $0x2b0] sm:$0xff]  ;;  %v888_v50 = vmax.f32 %v93_v42, %v95_v43  ;;  %v97_v56 = vld [vmem:[%s1178_s0 + $0x2c8] sm:$0xf]  ;;  %v99_v57 = vld [vmem:[%s1178_s0 + $0x2d8] sm:$0xf] }
  0x1f   :  { %v892_v51 = vmax.f32 %v92_v48, %v94_v49  ;;  %v96_v60 = vld [vmem:[%s1178_s0 + $0x2c0] sm:$0xff]  ;;  %v98_v61 = vld [vmem:[%s1178_s0 + $0x2d0] sm:$0xff]  ;;  %v908_v2 = vmax.f32 %v97_v56, %v99_v57  ;;  %v101_v5 = vld [vmem:[%s1178_s0 + $0x2e8] sm:$0xf] }
  0x20   :  { %230 = vrot.lane.b32.xlu1 %v608_v46, %s447_s22  ;;  %v912_v4 = vmax.f32 %v96_v60, %v98_v61  ;;  %v103_v6 = vld [vmem:[%s1178_s0 + $0x2f8] sm:$0xf]  ;;  %v100_v14 = vld [vmem:[%s1178_s0 + $0x2e0] sm:$0xff]  ;;  %v102_v15 = vld [vmem:[%s1178_s0 + $0x2f0] sm:$0xff] }
  0x21   :  { %228 = vrot.lane.b32.xlu0 %v612_v47, %s447_s22  ;;  %v928_v20 = vmax.f32 %v101_v5, %v103_v6  ;;  %v932_v21 = vmax.f32 %v100_v14, %v102_v15 }
  0x24   :  { %234 = vrot.lane.b32.xlu1 %v628_v52, %s447_s22 }
  0x25   :  { %232 = vrot.lane.b32.xlu0 %v632_v53, %s447_s22 }
  0x28   :  { %238 = vrot.lane.b32.xlu1 %v648_v58, %s447_s22 }
  0x29   :  { %236 = vrot.lane.b32.xlu0 %v652_v59, %s447_s22 }
  0x2c   :  { %242 = vrot.lane.b32.xlu1 %v668_v0, %s447_s22 }
  0x2d   :  { %240 = vrot.lane.b32.xlu0 %v672_v1, %s447_s22 }
  0x30   :  { %246 = vrot.lane.b32.xlu1 %v688_v8, %s447_s22 }
  0x31   :  { %244 = vrot.lane.b32.xlu0 %v692_v9, %s447_s22 }
  0x34   :  { %250 = vrot.lane.b32.xlu1 %v708_v18, %s447_s22 }
  0x35   :  { %248 = vrot.lane.b32.xlu0 %v712_v19, %s447_s22 }
  0x38   :  { %254 = vrot.lane.b32.xlu1 %v728_v26, %s447_s22 }
  0x39   :  { %252 = vrot.lane.b32.xlu0 %v732_v27, %s447_s22 }
  0x3c   :  { %258 = vrot.lane.b32.xlu1 %v748_v36, %s447_s22 }
  0x3d   :  { %256 = vrot.lane.b32.xlu0 %v752_v37, %s447_s22 }
  0x40   :  { %262 = vrot.lane.b32.xlu1 %v768_v44, %s447_s22 }
  0x41   :  { %260 = vrot.lane.b32.xlu0 %v772_v45, %s447_s22 }
  0x44   :  { %266 = vrot.lane.b32.xlu1 %v788_v54, %s447_s22 }
  0x45   :  { %264 = vrot.lane.b32.xlu0 %v792_v55, %s447_s22 }
  0x48   :  { %270 = vrot.lane.b32.xlu1 %v808_v62, %s447_s22 }
  0x49   :  { %268 = vrot.lane.b32.xlu0 %v812_v63, %s447_s22 }
  0x4c   :  { %274 = vrot.lane.b32.xlu1 %v828_v12, %s447_s22 }
  0x4d   :  { %272 = vrot.lane.b32.xlu0 %v832_v13, %s447_s22 }
  0x50   :  { %278 = vrot.lane.b32.xlu1 %v848_v24, %s447_s22 }
  0x51   :  { %276 = vrot.lane.b32.xlu0 %v852_v25, %s447_s22 }
  0x54   :  { %282 = vrot.lane.b32.xlu1 %v868_v38, %s447_s22 }
  0x55   :  { %280 = vrot.lane.b32.xlu0 %v872_v39, %s447_s22 }
  0x58   :  { %286 = vrot.lane.b32.xlu1 %v888_v50, %s447_s22 }
  0x59   :  { %284 = vrot.lane.b32.xlu0 %v892_v51, %s447_s22 }
  0x5c   :  { %290 = vrot.lane.b32.xlu1 %v908_v2, %s447_s22 }
  0x5d   :  { %288 = vrot.lane.b32.xlu0 %v912_v4, %s447_s22 }
  0x60   :  { %294 = vrot.lane.b32.xlu1 %v928_v20, %s447_s22 }
  0x61   :  { %292 = vrot.lane.b32.xlu0 %v932_v21, %s447_s22 }
  0x76   :  { %v205_v30 = vpop.permute.xlu1 %204 }
  0x77   :  { %v346_v31 = vmax.f32 %v467_v3, %v205_v30  ;;  %v201_v32 = vpop.permute.xlu0 %200 }
  0x78   :  { %v344_v33 = vmax.f32 %v478_v7, %v201_v32 }
  0x79   :  { %396 = vst.msk [vmem:[%s1179_s1 + $0x10] sm:$0xff] %vm392_vm0, %v346_v31 }
  0x7a   :  { %393 = vst.msk [vmem:[%s1179_s1] sm:$0xff] %vm392_vm0, %v344_v33  ;;  %v207_v42 = vpop.permute.xlu1 %206 }
  0x7b   :  { %v347_v43 = vmax.f32 %v488_v10, %v207_v42  ;;  %v203_v48 = vpop.permute.xlu0 %202 }
  0x7c   :  { %v345_v3 = vmax.f32 %v492_v11, %v203_v48 }
  0x7d   :  { %397 = vst.msk [vmem:[%s1179_s1 + $0x18] sm:$0xf] %vm394_vm1, %v347_v43 }
  0x7e   :  { %395 = vst.msk [vmem:[%s1179_s1 + $0x8] sm:$0xf] %vm394_vm1, %v345_v3  ;;  %v211_v7 = vpop.permute.xlu1 %210 }
  0x7f   :  { %v349_v49 = vmax.f32 %v508_v16, %v211_v7  ;;  %v209_v56 = vpop.permute.xlu0 %208 }
  0x80   :  { %v348_v57 = vmax.f32 %v512_v17, %v209_v56 }
  0x81   :  { %399 = vst.msk [vmem:[%s1179_s1 + $0x28] sm:$0xf] %vm394_vm1, %v349_v49 }
  0x82   :  { %398 = vst.msk [vmem:[%s1179_s1 + $0x20] sm:$0xff] %vm392_vm0, %v348_v57  ;;  %v215_v10 = vpop.permute.xlu1 %214 }
  0x83   :  { %v351_v11 = vmax.f32 %v528_v22, %v215_v10  ;;  %v213_v60 = vpop.permute.xlu0 %212 }
  0x84   :  { %v350_v61 = vmax.f32 %v532_v23, %v213_v60 }
  0x85   :  { %401 = vst.msk [vmem:[%s1179_s1 + $0x38] sm:$0xf] %vm394_vm1, %v351_v11 }
  0x86   :  { %400 = vst.msk [vmem:[%s1179_s1 + $0x30] sm:$0xff] %vm392_vm0, %v350_v61  ;;  %v219_v16 = vpop.permute.xlu1 %218 }
  0x87   :  { %v353_v17 = vmax.f32 %v548_v28, %v219_v16  ;;  %v217_v5 = vpop.permute.xlu0 %216 }
  0x88   :  { %v352_v6 = vmax.f32 %v552_v29, %v217_v5 }
  0x89   :  { %403 = vst.msk [vmem:[%s1179_s1 + $0x48] sm:$0xf] %vm394_vm1, %v353_v17 }
  0x8a   :  { %402 = vst.msk [vmem:[%s1179_s1 + $0x40] sm:$0xff] %vm392_vm0, %v352_v6  ;;  %v223_v22 = vpop.permute.xlu1 %222 }
  0x8b   :  { %v355_v23 = vmax.f32 %v568_v34, %v223_v22  ;;  %v221_v14 = vpop.permute.xlu0 %220 }
  0x8c   :  { %v354_v15 = vmax.f32 %v572_v35, %v221_v14 }
  0x8d   :  { %405 = vst.msk [vmem:[%s1179_s1 + $0x58] sm:$0xf] %vm394_vm1, %v355_v23 }
  0x8e   :  { %404 = vst.msk [vmem:[%s1179_s1 + $0x50] sm:$0xff] %vm392_vm0, %v354_v15  ;;  %v227_v28 = vpop.permute.xlu1 %226 }
  0x8f   :  { %v357_v29 = vmax.f32 %v588_v40, %v227_v28  ;;  %v225_v30 = vpop.permute.xlu0 %224 }
  0x90   :  { %v356_v31 = vmax.f32 %v592_v41, %v225_v30 }
  0x91   :  { %407 = vst.msk [vmem:[%s1179_s1 + $0x68] sm:$0xf] %vm394_vm1, %v357_v29 }
  0x92   :  { %406 = vst.msk [vmem:[%s1179_s1 + $0x60] sm:$0xff] %vm392_vm0, %v356_v31  ;;  %v231_v34 = vpop.permute.xlu1 %230 }
  0x93   :  { %v359_v35 = vmax.f32 %v608_v46, %v231_v34  ;;  %v229_v32 = vpop.permute.xlu0 %228 }
  0x94   :  { %v358_v33 = vmax.f32 %v612_v47, %v229_v32 }
  0x95   :  { %409 = vst.msk [vmem:[%s1179_s1 + $0x78] sm:$0xf] %vm394_vm1, %v359_v35 }
  0x96   :  { %408 = vst.msk [vmem:[%s1179_s1 + $0x70] sm:$0xff] %vm392_vm0, %v358_v33  ;;  %v235_v40 = vpop.permute.xlu1 %234 }
  0x97   :  { %v361_v41 = vmax.f32 %v628_v52, %v235_v40  ;;  %v233_v42 = vpop.permute.xlu0 %232 }
  0x98   :  { %v360_v43 = vmax.f32 %v632_v53, %v233_v42 }
  0x99   :  { %411 = vst.msk [vmem:[%s1179_s1 + $0x88] sm:$0xf] %vm394_vm1, %v361_v41 }
  0x9a   :  { %410 = vst.msk [vmem:[%s1179_s1 + $0x80] sm:$0xff] %vm392_vm0, %v360_v43  ;;  %v239_v46 = vpop.permute.xlu1 %238 }
  0x9b   :  { %v363_v47 = vmax.f32 %v648_v58, %v239_v46  ;;  %v237_v48 = vpop.permute.xlu0 %236 }
  0x9c   :  { %v362_v3 = vmax.f32 %v652_v59, %v237_v48 }
  0x9d   :  { %413 = vst.msk [vmem:[%s1179_s1 + $0x98] sm:$0xf] %vm394_vm1, %v363_v47 }
  0x9e   :  { %412 = vst.msk [vmem:[%s1179_s1 + $0x90] sm:$0xff] %vm392_vm0, %v362_v3  ;;  %v243_v52 = vpop.permute.xlu1 %242 }
  0x9f   :  { %v365_v53 = vmax.f32 %v668_v0, %v243_v52  ;;  %v241_v7 = vpop.permute.xlu0 %240 }
  0xa0   :  { %v364_v49 = vmax.f32 %v672_v1, %v241_v7 }
  0xa1   :  { %415 = vst.msk [vmem:[%s1179_s1 + $0xa8] sm:$0xf] %vm394_vm1, %v365_v53 }
  0xa2   :  { %414 = vst.msk [vmem:[%s1179_s1 + $0xa0] sm:$0xff] %vm392_vm0, %v364_v49  ;;  %v247_v58 = vpop.permute.xlu1 %246 }
  0xa3   :  { %v367_v59 = vmax.f32 %v688_v8, %v247_v58  ;;  %v245_v56 = vpop.permute.xlu0 %244 }
  0xa4   :  { %v366_v57 = vmax.f32 %v692_v9, %v245_v56 }
  0xa5   :  { %417 = vst.msk [vmem:[%s1179_s1 + $0xb8] sm:$0xf] %vm394_vm1, %v367_v59 }
  0xa6   :  { %416 = vst.msk [vmem:[%s1179_s1 + $0xb0] sm:$0xff] %vm392_vm0, %v366_v57  ;;  %v251_v0 = vpop.permute.xlu1 %250 }
  0xa7   :  { %v369_v1 = vmax.f32 %v708_v18, %v251_v0  ;;  %v249_v10 = vpop.permute.xlu0 %248 }
  0xa8   :  { %v368_v11 = vmax.f32 %v712_v19, %v249_v10 }
  0xa9   :  { %419 = vst.msk [vmem:[%s1179_s1 + $0xc8] sm:$0xf] %vm394_vm1, %v369_v1 }
  0xaa   :  { %418 = vst.msk [vmem:[%s1179_s1 + $0xc0] sm:$0xff] %vm392_vm0, %v368_v11  ;;  %v255_v8 = vpop.permute.xlu1 %254 }
  0xab   :  { %v371_v9 = vmax.f32 %v728_v26, %v255_v8  ;;  %v253_v60 = vpop.permute.xlu0 %252 }
  0xac   :  { %v370_v61 = vmax.f32 %v732_v27, %v253_v60 }
  0xad   :  { %421 = vst.msk [vmem:[%s1179_s1 + $0xd8] sm:$0xf] %vm394_vm1, %v371_v9 }
  0xae   :  { %420 = vst.msk [vmem:[%s1179_s1 + $0xd0] sm:$0xff] %vm392_vm0, %v370_v61  ;;  %v259_v18 = vpop.permute.xlu1 %258 }
  0xaf   :  { %v373_v19 = vmax.f32 %v748_v36, %v259_v18  ;;  %v257_v16 = vpop.permute.xlu0 %256 }
  0xb0   :  { %v372_v17 = vmax.f32 %v752_v37, %v257_v16 }
  0xb1   :  { %423 = vst.msk [vmem:[%s1179_s1 + $0xe8] sm:$0xf] %vm394_vm1, %v373_v19 }
  0xb2   :  { %422 = vst.msk [vmem:[%s1179_s1 + $0xe0] sm:$0xff] %vm392_vm0, %v372_v17  ;;  %v263_v26 = vpop.permute.xlu1 %262 }
  0xb3   :  { %v375_v27 = vmax.f32 %v768_v44, %v263_v26  ;;  %v261_v5 = vpop.permute.xlu0 %260 }
  0xb4   :  { %v374_v6 = vmax.f32 %v772_v45, %v261_v5 }
  0xb5   :  { %425 = vst.msk [vmem:[%s1179_s1 + $0xf8] sm:$0xf] %vm394_vm1, %v375_v27 }
  0xb6   :  { %424 = vst.msk [vmem:[%s1179_s1 + $0xf0] sm:$0xff] %vm392_vm0, %v374_v6  ;;  %v267_v36 = vpop.permute.xlu1 %266 }
  0xb7   :  { %v377_v37 = vmax.f32 %v788_v54, %v267_v36  ;;  %v265_v22 = vpop.permute.xlu0 %264 }
  0xb8   :  { %v376_v23 = vmax.f32 %v792_v55, %v265_v22 }
  0xb9   :  { %427 = vst.msk [vmem:[%s1179_s1 + $0x108] sm:$0xf] %vm394_vm1, %v377_v37 }
  0xba   :  { %426 = vst.msk [vmem:[%s1179_s1 + $0x100] sm:$0xff] %vm392_vm0, %v376_v23  ;;  %v271_v44 = vpop.permute.xlu1 %270 }
  0xbb   :  { %v379_v45 = vmax.f32 %v808_v62, %v271_v44  ;;  %v269_v14 = vpop.permute.xlu0 %268 }
  0xbc   :  { %v378_v15 = vmax.f32 %v812_v63, %v269_v14 }
  0xbd   :  { %429 = vst.msk [vmem:[%s1179_s1 + $0x118] sm:$0xf] %vm394_vm1, %v379_v45 }
  0xbe   :  { %428 = vst.msk [vmem:[%s1179_s1 + $0x110] sm:$0xff] %vm392_vm0, %v378_v15  ;;  %v275_v54 = vpop.permute.xlu1 %274 }
  0xbf   :  { %v381_v55 = vmax.f32 %v828_v12, %v275_v54  ;;  %v273_v28 = vpop.permute.xlu0 %272 }
  0xc0   :  { %v380_v29 = vmax.f32 %v832_v13, %v273_v28 }
  0xc1   :  { %431 = vst.msk [vmem:[%s1179_s1 + $0x128] sm:$0xf] %vm394_vm1, %v381_v55 }
  0xc2   :  { %430 = vst.msk [vmem:[%s1179_s1 + $0x120] sm:$0xff] %vm392_vm0, %v380_v29  ;;  %v279_v62 = vpop.permute.xlu1 %278 }
  0xc3   :  { %v383_v63 = vmax.f32 %v848_v24, %v279_v62  ;;  %v277_v30 = vpop.permute.xlu0 %276 }
  0xc4   :  { %v382_v31 = vmax.f32 %v852_v25, %v277_v30 }
  0xc5   :  { %433 = vst.msk [vmem:[%s1179_s1 + $0x138] sm:$0xf] %vm394_vm1, %v383_v63 }
  0xc6   :  { %432 = vst.msk [vmem:[%s1179_s1 + $0x130] sm:$0xff] %vm392_vm0, %v382_v31  ;;  %v283_v12 = vpop.permute.xlu1 %282 }
  0xc7   :  { %v385_v13 = vmax.f32 %v868_v38, %v283_v12  ;;  %v281_v34 = vpop.permute.xlu0 %280 }
  0xc8   :  { %v384_v35 = vmax.f32 %v872_v39, %v281_v34 }
  0xc9   :  { %435 = vst.msk [vmem:[%s1179_s1 + $0x148] sm:$0xf] %vm394_vm1, %v385_v13 }
  0xca   :  { %434 = vst.msk [vmem:[%s1179_s1 + $0x140] sm:$0xff] %vm392_vm0, %v384_v35  ;;  %v287_v24 = vpop.permute.xlu1 %286 }
  0xcb   :  { %v387_v25 = vmax.f32 %v888_v50, %v287_v24  ;;  %v285_v32 = vpop.permute.xlu0 %284 }
  0xcc   :  { %v386_v33 = vmax.f32 %v892_v51, %v285_v32 }
  0xcd   :  { %437 = vst.msk [vmem:[%s1179_s1 + $0x158] sm:$0xf] %vm394_vm1, %v387_v25 }
  0xce   :  { %436 = vst.msk [vmem:[%s1179_s1 + $0x150] sm:$0xff] %vm392_vm0, %v386_v33  ;;  %v291_v38 = vpop.permute.xlu1 %290 }
  0xcf   :  { %v389_v39 = vmax.f32 %v908_v2, %v291_v38  ;;  %v289_v40 = vpop.permute.xlu0 %288 }
  0xd0   :  { %v388_v41 = vmax.f32 %v912_v4, %v289_v40 }
  0xd1   :  { %439 = vst.msk [vmem:[%s1179_s1 + $0x168] sm:$0xf] %vm394_vm1, %v389_v39 }
  0xd2   :  { %438 = vst.msk [vmem:[%s1179_s1 + $0x160] sm:$0xff] %vm392_vm0, %v388_v41  ;;  %v295_v50 = vpop.permute.xlu1 %294 }
  0xd3   :  { %v391_v51 = vmax.f32 %v928_v20, %v295_v50  ;;  %v293_v42 = vpop.permute.xlu0 %292 }
  0xd4   :  { %v390_v43 = vmax.f32 %v932_v21, %v293_v42 }
  0xd5   :  { %441 = vst.msk [vmem:[%s1179_s1 + $0x178] sm:$0xf] %vm394_vm1, %v391_v51 }
  0xd6   :  { %440 = vst.msk [vmem:[%s1179_s1 + $0x170] sm:$0xff] %vm392_vm0, %v390_v43 }

// kernel: lenet_forward.5
= control target key start
LH: loop header
LB: loop body
LE: loop exit
PB: predicated region body
PF: predicated region fallthrough
CT: control target
= control target key end

     0   :  { %s1860_s12 = smov 0   ;;  %s1862_s13 = smov 0   ;;  %s2375_s0 = inlined_call_operand.vmem [shape: bf16[1152,25], index: 0, kind: input, shape index: {}]   ;;  %s2376_s1 = inlined_call_operand.vmem [shape: bf16[25,10], index: 1, kind: input, shape index: {}]   ;;  %s2377_s2 = inlined_call_operand.vmem [shape: f32[1,10], index: 2, kind: input, shape index: {}]   ;;  %s2378_s3 = inlined_call_operand.vmem [shape: f32[1152,10], index: 3, kind: output, shape index: {}]  }
   0x1   :  { %s1864_s14 = smov 0  }
   0x2 LB: > { %s1873_s15 = sadd.s32 4294967295, %s1805_s14   ;;  %s1875_s16 = sadd.s32 1, %s1805_s14   ;;  %s1805_s14 = sphi %s1864_s14, %s2387_s14   ;;  %s1801_s13 = sphi %s1862_s13, %s2386_s13   ;;  %s1797_s12 = sphi %s1860_s12, %s2385_s12  }
   0x3   : > { %s85_s17 = ssub.s32 %s1805_s14, %s1875_s16  ;;  %s88_s18 = sadd.s32 1, %s1801_s13 }
   0x4   : > { %p86_p0 = scmp.eq.s32.totalorder %s85_s17, 0  ;;  %p98_p1 = scmp.ne.s32.totalorder %s1801_s13, %s1797_s12 }
   0x5   : > { %p99_p2 = scmp.eq.s32.totalorder %s1873_s15, 2  ;;  %p1431_p3 = scmp.ge.s32.totalorder %s1805_s14, 1 }
   0x6   : > { %s1883_s19 = scalar_select %p86_p0, %s1801_s13, %s88_s18  }
   0x7   : > { %p1885_p4 = por %p99_p2, %p98_p1  ;;  %p146_p5 = scmp.lt.s32.totalorder %s1805_s14, 4 }
   0x9   : > { %p147_p6 = pnand %p1431_p3, %p146_p5 }
   0xa   : > { %v1717_v0 = vld [vmem:[%s2376_s1] sm:$0xff] (!%p147_p6)   ;;  %vm536_vm0 = vcmask (!%p147_p6), 1043456   ;;  %v1718_v1 = vld [vmem:[%s2376_s1 + $0x8] sm:$0x1f] (!%p147_p6)   ;;  %vm537_vm1 = vcmask (!%p147_p6), 1044480   ;;  %s1896_s25 = sshll.u32 (!%p147_p6), %s1873_s15, 6 }
   0xb   : > { %150 = sbr.rel (%p147_p6) target bundleno = 373 (0x175), region = 32  ;;  %1556 = vmatprep.subr.bf16.mxu0 (!%p147_p6), %v1717_v0  ;;  %1624 = vmatprep.subr.bf16.mxu1 (!%p147_p6), %v1717_v0  ;;  %v1839_v2 = vmov (!%p147_p6), 65535   ;;  %p178_p7 = scmp.lt.s32.totalorder (!%p147_p6), %s1896_s25, 143  ;;  %vm439_vm2 = vcmask (!%p147_p6), 203776   ;;  %v1973_v38 = vld [vmem:[%s2377_s2] ss:$0 sm:$0xff] (!%p147_p6) }
   0xc   : > { %1557 = vmatpush3.bf16.msra.mxu0 (!%p147_p6), %v1717_v0  ;;  %1626 = vmatpush3.bf16.msra.mxu1 (!%p147_p6), %v1717_v0  ;;  %v538_v3 = vsel (!%p147_p6), %vm536_vm0, 4294967295, %v1839_v2  ;;  %s170_s4 = sand.u32 (!%p147_p6), 1, %s1797_s12   ;;  %vm896_vm3 = vcmask (!%p147_p6), 80896  }
   0xd   : > { %v539_v4 = vsel (!%p147_p6), %vm537_vm1, %v538_v3, 0  ;;  %s1432_s7 = sshll.u32 (!%p147_p6), %s170_s4, 9 }
   0xe   : > { %v541_v5 = vand.u32 (!%p147_p6), %v1718_v1, %v539_v4  ;;  %s1982_s8 = scalar_lea.vmem (!%p147_p6), [#allocation2], %s1432_s7  }
  0x10   : > { %1558 = vmatprep.subr.bf16.mxu0 (!%p147_p6), %v541_v5  ;;  %1625 = vmatprep.subr.bf16.mxu1 (!%p147_p6), %v541_v5 }
  0x11   : > { %1559 = vmatpush3.bf16.msra.mxu0 (!%p147_p6), %v541_v5  ;;  %1627 = vmatpush3.bf16.msra.mxu1 (!%p147_p6), %v541_v5 }
  0x12   : > { %s179_s26 = scalar_select %p178_p7, %s1896_s25, 143 }
  0x13   : > { %s969_s9 = ssub.s32 (%p1885_p4), 144, %s1896_s25  ;;  %s1519_s10 = sshll.u32 (%p1885_p4), %s1873_s15, 9 }
  0x14   : > { %s1434_s27 = sshll.u32 %s179_s26, 2  ;;  %p970_p8 = scmp.lt.s32.totalorder (%p1885_p4), %s969_s9, 64 }
  0x15   : > { %s1903_s30 = scalar_lea.vmem %s2375_s0, %s1434_s27  ;;  %s2176_s14 = scalar_lea.vmem (%p1885_p4), %s2378_s3, %s1519_s10  }
  0x16   : > { %v1719_v6 = vld [vmem:[%s1903_s30] sm:$0xff]   ;;  %v1721_v8 = vld [vmem:[%s1903_s30 + $0x8] sm:$0xff]   ;;  %v1723_v10 = vld [vmem:[%s1903_s30 + $0x10] sm:$0xff]  }
  0x17   : > { %v1720_v7 = vld [vmem:[%s1903_s30 + $0x80] sm:$0xff]   ;;  %1560 = vmatprep.mubr.msk.bf16.mxu0 %vm439_vm2, %v1719_v6  ;;  %v1722_v9 = vld [vmem:[%s1903_s30 + $0x88] sm:$0xff]   ;;  %v1724_v11 = vld [vmem:[%s1903_s30 + $0x90] sm:$0xff]  }
  0x18   : > { %1592 = vmatprep.mubr.msk.bf16.mxu1 %vm439_vm2, %v1720_v7  ;;  %1561 = vmatmul.mubr.msk.bf16.vlgmr.msra.gmra.mrb[0].mxu0 %vm439_vm2, %v1721_v8  ;;  %v1725_v12 = vld [vmem:[%s1903_s30 + $0x18] sm:$0xff]   ;;  %v1727_v14 = vld [vmem:[%s1903_s30 + $0x20] sm:$0xff]   ;;  %v1729_v16 = vld [vmem:[%s1903_s30 + $0x28] sm:$0xff]  }
  0x19   : > { %1593 = vmatmul.mubr.msk.bf16.vlgmr.msra.gmra.mrb[0].mxu1 %vm439_vm2, %v1722_v9  ;;  %1564 = vmatprep.mubr.msk.bf16.mxu0 %vm439_vm2, %v1723_v10  ;;  %v1726_v13 = vld [vmem:[%s1903_s30 + $0x98] sm:$0xff]   ;;  %v1728_v15 = vld [vmem:[%s1903_s30 + $0xa0] sm:$0xff]   ;;  %v1730_v17 = vld [vmem:[%s1903_s30 + $0xa8] sm:$0xff]  }
  0x1a   : > { %1596 = vmatprep.mubr.msk.bf16.mxu1 %vm439_vm2, %v1724_v11  ;;  %v1731_v18 = vld [vmem:[%s1903_s30 + $0x30] sm:$0xff]   ;;  %v1733_v20 = vld [vmem:[%s1903_s30 + $0x38] sm:$0xff]   ;;  %v1735_v22 = vld [vmem:[%s1903_s30 + $0x40] sm:$0xff]  }
  0x1b   : > { %v1732_v19 = vld [vmem:[%s1903_s30 + $0xb0] sm:$0xff]   ;;  %v1734_v21 = vld [vmem:[%s1903_s30 + $0xb8] sm:$0xff]   ;;  %v1736_v23 = vld [vmem:[%s1903_s30 + $0xc0] sm:$0xff]  }
  0x1c   : > { %v1737_v24 = vld [vmem:[%s1903_s30 + $0x48] sm:$0xff]   ;;  %v1739_v26 = vld [vmem:[%s1903_s30 + $0x50] sm:$0xff]   ;;  %v1741_v28 = vld [vmem:[%s1903_s30 + $0x58] sm:$0xff]  }
  0x1d   : > { %v1738_v25 = vld [vmem:[%s1903_s30 + $0xc8] sm:$0xff]   ;;  %v1740_v27 = vld [vmem:[%s1903_s30 + $0xd0] sm:$0xff]   ;;  %v1742_v29 = vld [vmem:[%s1903_s30 + $0xd8] sm:$0xff]  }
  0x1e   : > { %v1743_v30 = vld [vmem:[%s1903_s30 + $0x60] sm:$0xff]   ;;  %v1745_v32 = vld [vmem:[%s1903_s30 + $0x68] sm:$0xff]   ;;  %v1747_v34 = vld [vmem:[%s1903_s30 + $0x70] sm:$0xff]  }
  0x1f   : > { %v1744_v31 = vld [vmem:[%s1903_s30 + $0xe0] sm:$0xff]   ;;  %v1746_v33 = vld [vmem:[%s1903_s30 + $0xe8] sm:$0xff]   ;;  %v1748_v35 = vld [vmem:[%s1903_s30 + $0xf0] sm:$0xff]  }
  0x20   : > { %1565 = vmatmul.mubr.msk.bf16.gmra.mrb[4].mxu0 %vm439_vm2, %v1725_v12  ;;  %v1749_v36 = vld [vmem:[%s1903_s30 + $0x78] sm:$0xff]  }
  0x21   : > { %1597 = vmatmul.mubr.msk.bf16.gmra.mrb[4].mxu1 %vm439_vm2, %v1726_v13  ;;  %1568 = vmatprep.mubr.msk.bf16.mxu0 %vm439_vm2, %v1727_v14  ;;  %v1750_v37 = vld [vmem:[%s1903_s30 + $0xf8] sm:$0xff]  }
  0x22   : > { %1600 = vmatprep.mubr.msk.bf16.mxu1 %vm439_vm2, %v1728_v15 }
  0x28   : > { %1569 = vmatmul.mubr.msk.bf16.gmra.mrb[8].mxu0 %vm439_vm2, %v1729_v16 }
  0x29   : > { %1601 = vmatmul.mubr.msk.bf16.gmra.mrb[8].mxu1 %vm439_vm2, %v1730_v17  ;;  %1572 = vmatprep.mubr.msk.bf16.mxu0 %vm439_vm2, %v1731_v18 }
  0x2a   : > { %1604 = vmatprep.mubr.msk.bf16.mxu1 %vm439_vm2, %v1732_v19 }
  0x30   : > { %1573 = vmatmul.mubr.msk.bf16.gmra.mrb[12].mxu0 %vm439_vm2, %v1733_v20 }
  0x31   : > { %1605 = vmatmul.mubr.msk.bf16.gmra.mrb[12].mxu1 %vm439_vm2, %v1734_v21  ;;  %1576 = vmatprep.mubr.msk.bf16.mxu0 %vm439_vm2, %v1735_v22 }
  0x32   : > { %1608 = vmatprep.mubr.msk.bf16.mxu1 %vm439_vm2, %v1736_v23 }
  0x38   : > { %1577 = vmatmul.mubr.msk.bf16.gmra.mrb[16].mxu0 %vm439_vm2, %v1737_v24 }
  0x39   : > { %1609 = vmatmul.mubr.msk.bf16.gmra.mrb[16].mxu1 %vm439_vm2, %v1738_v25  ;;  %1580 = vmatprep.mubr.msk.bf16.mxu0 %vm439_vm2, %v1739_v26 }
  0x3a   : > { %1612 = vmatprep.mubr.msk.bf16.mxu1 %vm439_vm2, %v1740_v27 }
  0x40   : > { %1581 = vmatmul.mubr.msk.bf16.gmra.mrb[20].mxu0 %vm439_vm2, %v1741_v28 }
  0x41   : > { %1613 = vmatmul.mubr.msk.bf16.gmra.mrb[20].mxu1 %vm439_vm2, %v1742_v29  ;;  %1584 = vmatprep.mubr.msk.bf16.mxu0 %vm439_vm2, %v1743_v30 }
  0x42   : > { %1616 = vmatprep.mubr.msk.bf16.mxu1 %vm439_vm2, %v1744_v31 }
  0x48   : > { %1585 = vmatmul.mubr.msk.bf16.gmra.mrb[24].mxu0 %vm439_vm2, %v1745_v32 }
  0x49   : > { %1617 = vmatmul.mubr.msk.bf16.gmra.mrb[24].mxu1 %vm439_vm2, %v1746_v33  ;;  %1588 = vmatprep.mubr.msk.bf16.mxu0 %vm439_vm2, %v1747_v34 }
  0x4a   : > { %1620 = vmatprep.mubr.msk.bf16.mxu1 %vm439_vm2, %v1748_v35 }
  0x50   : > { %1589 = vmatmul.mubr.msk.bf16.gmra.mrb[28].mxu0 %vm439_vm2, %v1749_v36 }
  0x51   : > { %1621 = vmatmul.mubr.msk.bf16.gmra.mrb[28].mxu1 %vm439_vm2, %v1750_v37 }
  0xeb   : > { %v1562_v39 = vpop.f32.mrb[0].mxu0 }
  0xec   : > { %v586_v40 = vadd.f32 %v1562_v39, %v1973_v38  ;;  %v1594_v41 = vpop.f32.mrb[0].mxu1  ;;  %v577_v42 = vpop.f32.mrb[1].mxu0 }
  0xed   : > { %v714_v43 = vadd.f32 %v1594_v41, %v1973_v38  ;;  %v578_v44 = vadd.f32 %v1973_v38, %v577_v42  ;;  %v705_v45 = vpop.f32.mrb[1].mxu1  ;;  %v1563_v46 = vpop.f32.mrb[2].mxu0 }
  0xee   : > { %v834_v47 = vmax.f32 %v586_v40, 0.0  ;;  %v706_v48 = vadd.f32 %v1973_v38, %v705_v45  ;;  %v589_v49 = vadd.f32 %v1563_v46, %v1973_v38  ;;  %v1595_v50 = vpop.f32.mrb[2].mxu1  ;;  %v580_v51 = vpop.f32.mrb[3].mxu0 }
  0xef   : > { %v866_v52 = vmax.f32 %v714_v43, 0.0  ;;  %v832_v53 = vmax.f32 %v578_v44, 0.0  ;;  %v717_v54 = vadd.f32 %v1595_v50, %v1973_v38  ;;  %v581_v55 = vadd.f32 %v1973_v38, %v580_v51  ;;  %v708_v56 = vpop.f32.mrb[3].mxu1 }
  0xf0   : > { %899 = vst.msk [vmem:[%s1982_s8 + $0x10] sm:$0xff] %vm896_vm3, %v834_v47  ;;  %v864_v57 = vmax.f32 %v706_v48, 0.0  ;;  %v835_v58 = vmax.f32 %v589_v49, 0.0  ;;  %v709_v59 = vadd.f32 %v1973_v38, %v708_v56 }
  0xf1   : > { %931 = vst.msk [vmem:[%s1982_s8 + $0x110] sm:$0xff] %vm896_vm3, %v866_v52  ;;  %897 = vst.msk [vmem:[%s1982_s8] sm:$0xff] %vm896_vm3, %v832_v53  ;;  %v867_v60 = vmax.f32 %v717_v54, 0.0  ;;  %v833_v61 = vmax.f32 %v581_v55, 0.0 }
  0xf2   : > { %929 = vst.msk [vmem:[%s1982_s8 + $0x100] sm:$0xff] %vm896_vm3, %v864_v57  ;;  %900 = vst.msk [vmem:[%s1982_s8 + $0x18] sm:$0xff] %vm896_vm3, %v835_v58  ;;  %v865_v62 = vmax.f32 %v709_v59, 0.0 }
  0xf3   : > { %932 = vst.msk [vmem:[%s1982_s8 + $0x118] sm:$0xff] %vm896_vm3, %v867_v60  ;;  %898 = vst.msk [vmem:[%s1982_s8 + $0x8] sm:$0xff] %vm896_vm3, %v833_v61  ;;  %v1566_v63 = vpop.f32.mrb[4].mxu0 }
  0xf4   : > { %930 = vst.msk [vmem:[%s1982_s8 + $0x108] sm:$0xff] %vm896_vm3, %v865_v62  ;;  %v602_v0 = vadd.f32 %v1566_v63, %v1973_v38  ;;  %v1598_v1 = vpop.f32.mrb[4].mxu1  ;;  %v593_v2 = vpop.f32.mrb[5].mxu0 }
  0xf5   : > { %v730_v3 = vadd.f32 %v1598_v1, %v1973_v38  ;;  %v594_v4 = vadd.f32 %v1973_v38, %v593_v2  ;;  %v721_v5 = vpop.f32.mrb[5].mxu1  ;;  %v1567_v6 = vpop.f32.mrb[6].mxu0 }
  0xf6   : > { %v838_v7 = vmax.f32 %v602_v0, 0.0  ;;  %v722_v8 = vadd.f32 %v1973_v38, %v721_v5  ;;  %v605_v9 = vadd.f32 %v1567_v6, %v1973_v38  ;;  %v1599_v10 = vpop.f32.mrb[6].mxu1  ;;  %v596_v11 = vpop.f32.mrb[7].mxu0 }
  0xf7   : > { %v870_v12 = vmax.f32 %v730_v3, 0.0  ;;  %v836_v13 = vmax.f32 %v594_v4, 0.0  ;;  %v733_v14 = vadd.f32 %v1599_v10, %v1973_v38  ;;  %v597_v15 = vadd.f32 %v1973_v38, %v596_v11  ;;  %v724_v16 = vpop.f32.mrb[7].mxu1 }
  0xf8   : > { %903 = vst.msk [vmem:[%s1982_s8 + $0x30] sm:$0xff] %vm896_vm3, %v838_v7  ;;  %v868_v17 = vmax.f32 %v722_v8, 0.0  ;;  %v839_v18 = vmax.f32 %v605_v9, 0.0  ;;  %v725_v19 = vadd.f32 %v1973_v38, %v724_v16 }
  0xf9   : > { %935 = vst.msk [vmem:[%s1982_s8 + $0x130] sm:$0xff] %vm896_vm3, %v870_v12  ;;  %901 = vst.msk [vmem:[%s1982_s8 + $0x20] sm:$0xff] %vm896_vm3, %v836_v13  ;;  %v871_v20 = vmax.f32 %v733_v14, 0.0  ;;  %v837_v21 = vmax.f32 %v597_v15, 0.0 }
  0xfa   : > { %933 = vst.msk [vmem:[%s1982_s8 + $0x120] sm:$0xff] %vm896_vm3, %v868_v17  ;;  %904 = vst.msk [vmem:[%s1982_s8 + $0x38] sm:$0xff] %vm896_vm3, %v839_v18  ;;  %v869_v22 = vmax.f32 %v725_v19, 0.0 }
  0xfb   : > { %936 = vst.msk [vmem:[%s1982_s8 + $0x138] sm:$0xff] %vm896_vm3, %v871_v20  ;;  %902 = vst.msk [vmem:[%s1982_s8 + $0x28] sm:$0xff] %vm896_vm3, %v837_v21  ;;  %v1570_v23 = vpop.f32.mrb[8].mxu0 }
  0xfc   : > { %934 = vst.msk [vmem:[%s1982_s8 + $0x128] sm:$0xff] %vm896_vm3, %v869_v22  ;;  %v618_v24 = vadd.f32 %v1570_v23, %v1973_v38  ;;  %v1602_v25 = vpop.f32.mrb[8].mxu1  ;;  %v609_v26 = vpop.f32.mrb[9].mxu0 }
  0xfd   : > { %v746_v27 = vadd.f32 %v1602_v25, %v1973_v38  ;;  %v610_v28 = vadd.f32 %v1973_v38, %v609_v26  ;;  %v737_v29 = vpop.f32.mrb[9].mxu1  ;;  %v1571_v30 = vpop.f32.mrb[10].mxu0 }
  0xfe   : > { %v842_v31 = vmax.f32 %v618_v24, 0.0  ;;  %v738_v32 = vadd.f32 %v1973_v38, %v737_v29  ;;  %v621_v33 = vadd.f32 %v1571_v30, %v1973_v38  ;;  %v1603_v34 = vpop.f32.mrb[10].mxu1  ;;  %v612_v35 = vpop.f32.mrb[11].mxu0 }
  0xff   : > { %v874_v36 = vmax.f32 %v746_v27, 0.0  ;;  %v840_v37 = vmax.f32 %v610_v28, 0.0  ;;  %v749_v39 = vadd.f32 %v1603_v34, %v1973_v38  ;;  %v613_v40 = vadd.f32 %v1973_v38, %v612_v35  ;;  %v740_v41 = vpop.f32.mrb[11].mxu1 }
 0x100   : > { %907 = vst.msk [vmem:[%s1982_s8 + $0x50] sm:$0xff] %vm896_vm3, %v842_v31  ;;  %v872_v42 = vmax.f32 %v738_v32, 0.0  ;;  %v843_v43 = vmax.f32 %v621_v33, 0.0  ;;  %v741_v44 = vadd.f32 %v1973_v38, %v740_v41 }
 0x101   : > { %939 = vst.msk [vmem:[%s1982_s8 + $0x150] sm:$0xff] %vm896_vm3, %v874_v36  ;;  %905 = vst.msk [vmem:[%s1982_s8 + $0x40] sm:$0xff] %vm896_vm3, %v840_v37  ;;  %v875_v45 = vmax.f32 %v749_v39, 0.0  ;;  %v841_v46 = vmax.f32 %v613_v40, 0.0 }
 0x102   : > { %937 = vst.msk [vmem:[%s1982_s8 + $0x140] sm:$0xff] %vm896_vm3, %v872_v42  ;;  %908 = vst.msk [vmem:[%s1982_s8 + $0x58] sm:$0xff] %vm896_vm3, %v843_v43  ;;  %v873_v47 = vmax.f32 %v741_v44, 0.0 }
 0x103   : > { %940 = vst.msk [vmem:[%s1982_s8 + $0x158] sm:$0xff] %vm896_vm3, %v875_v45  ;;  %906 = vst.msk [vmem:[%s1982_s8 + $0x48] sm:$0xff] %vm896_vm3, %v841_v46  ;;  %v1574_v48 = vpop.f32.mrb[12].mxu0 }
 0x104   : > { %938 = vst.msk [vmem:[%s1982_s8 + $0x148] sm:$0xff] %vm896_vm3, %v873_v47  ;;  %v634_v49 = vadd.f32 %v1574_v48, %v1973_v38  ;;  %v1606_v50 = vpop.f32.mrb[12].mxu1  ;;  %v625_v51 = vpop.f32.mrb[13].mxu0 }
 0x105   : > { %v762_v52 = vadd.f32 %v1606_v50, %v1973_v38  ;;  %v626_v53 = vadd.f32 %v1973_v38, %v625_v51  ;;  %v753_v54 = vpop.f32.mrb[13].mxu1  ;;  %v1575_v55 = vpop.f32.mrb[14].mxu0 }
 0x106   : > { %v846_v56 = vmax.f32 %v634_v49, 0.0  ;;  %v754_v57 = vadd.f32 %v1973_v38, %v753_v54  ;;  %v637_v58 = vadd.f32 %v1575_v55, %v1973_v38  ;;  %v1607_v59 = vpop.f32.mrb[14].mxu1  ;;  %v628_v60 = vpop.f32.mrb[15].mxu0 }
 0x107   : > { %v878_v61 = vmax.f32 %v762_v52, 0.0  ;;  %v844_v62 = vmax.f32 %v626_v53, 0.0  ;;  %v765_v63 = vadd.f32 %v1607_v59, %v1973_v38  ;;  %v629_v0 = vadd.f32 %v1973_v38, %v628_v60  ;;  %v756_v1 = vpop.f32.mrb[15].mxu1 }
 0x108   : > { %911 = vst.msk [vmem:[%s1982_s8 + $0x70] sm:$0xff] %vm896_vm3, %v846_v56  ;;  %v876_v2 = vmax.f32 %v754_v57, 0.0  ;;  %v847_v3 = vmax.f32 %v637_v58, 0.0  ;;  %v757_v4 = vadd.f32 %v1973_v38, %v756_v1 }
 0x109   : > { %943 = vst.msk [vmem:[%s1982_s8 + $0x170] sm:$0xff] %vm896_vm3, %v878_v61  ;;  %909 = vst.msk [vmem:[%s1982_s8 + $0x60] sm:$0xff] %vm896_vm3, %v844_v62  ;;  %v879_v5 = vmax.f32 %v765_v63, 0.0  ;;  %v845_v6 = vmax.f32 %v629_v0, 0.0 }
 0x10a   : > { %941 = vst.msk [vmem:[%s1982_s8 + $0x160] sm:$0xff] %vm896_vm3, %v876_v2  ;;  %912 = vst.msk [vmem:[%s1982_s8 + $0x78] sm:$0xff] %vm896_vm3, %v847_v3  ;;  %v877_v7 = vmax.f32 %v757_v4, 0.0 }
 0x10b   : > { %944 = vst.msk [vmem:[%s1982_s8 + $0x178] sm:$0xff] %vm896_vm3, %v879_v5  ;;  %910 = vst.msk [vmem:[%s1982_s8 + $0x68] sm:$0xff] %vm896_vm3, %v845_v6  ;;  %v1578_v8 = vpop.f32.mrb[16].mxu0 }
 0x10c   : > { %942 = vst.msk [vmem:[%s1982_s8 + $0x168] sm:$0xff] %vm896_vm3, %v877_v7  ;;  %v650_v9 = vadd.f32 %v1578_v8, %v1973_v38  ;;  %v1610_v10 = vpop.f32.mrb[16].mxu1  ;;  %v641_v11 = vpop.f32.mrb[17].mxu0 }
 0x10d   : > { %v778_v12 = vadd.f32 %v1610_v10, %v1973_v38  ;;  %v642_v13 = vadd.f32 %v1973_v38, %v641_v11  ;;  %v769_v14 = vpop.f32.mrb[17].mxu1  ;;  %v1579_v15 = vpop.f32.mrb[18].mxu0 }
 0x10e   : > { %v850_v16 = vmax.f32 %v650_v9, 0.0  ;;  %v770_v17 = vadd.f32 %v1973_v38, %v769_v14  ;;  %v653_v18 = vadd.f32 %v1579_v15, %v1973_v38  ;;  %v1611_v19 = vpop.f32.mrb[18].mxu1  ;;  %v644_v20 = vpop.f32.mrb[19].mxu0 }
 0x10f   : > { %v882_v21 = vmax.f32 %v778_v12, 0.0  ;;  %v848_v22 = vmax.f32 %v642_v13, 0.0  ;;  %v781_v23 = vadd.f32 %v1611_v19, %v1973_v38  ;;  %v645_v24 = vadd.f32 %v1973_v38, %v644_v20  ;;  %v772_v25 = vpop.f32.mrb[19].mxu1 }
 0x110   : > { %915 = vst.msk [vmem:[%s1982_s8 + $0x90] sm:$0xff] %vm896_vm3, %v850_v16  ;;  %v880_v26 = vmax.f32 %v770_v17, 0.0  ;;  %v851_v27 = vmax.f32 %v653_v18, 0.0  ;;  %v773_v28 = vadd.f32 %v1973_v38, %v772_v25 }
 0x111   : > { %947 = vst.msk [vmem:[%s1982_s8 + $0x190] sm:$0xff] %vm896_vm3, %v882_v21  ;;  %913 = vst.msk [vmem:[%s1982_s8 + $0x80] sm:$0xff] %vm896_vm3, %v848_v22  ;;  %v883_v29 = vmax.f32 %v781_v23, 0.0  ;;  %v849_v30 = vmax.f32 %v645_v24, 0.0 }
 0x112   : > { %945 = vst.msk [vmem:[%s1982_s8 + $0x180] sm:$0xff] %vm896_vm3, %v880_v26  ;;  %916 = vst.msk [vmem:[%s1982_s8 + $0x98] sm:$0xff] %vm896_vm3, %v851_v27  ;;  %v881_v31 = vmax.f32 %v773_v28, 0.0 }
 0x113   : > { %948 = vst.msk [vmem:[%s1982_s8 + $0x198] sm:$0xff] %vm896_vm3, %v883_v29  ;;  %914 = vst.msk [vmem:[%s1982_s8 + $0x88] sm:$0xff] %vm896_vm3, %v849_v30  ;;  %v1582_v32 = vpop.f32.mrb[20].mxu0 }
 0x114   : > { %946 = vst.msk [vmem:[%s1982_s8 + $0x188] sm:$0xff] %vm896_vm3, %v881_v31  ;;  %v666_v33 = vadd.f32 %v1582_v32, %v1973_v38  ;;  %v1614_v34 = vpop.f32.mrb[20].mxu1  ;;  %v657_v35 = vpop.f32.mrb[21].mxu0 }
 0x115   : > { %v794_v36 = vadd.f32 %v1614_v34, %v1973_v38  ;;  %v658_v37 = vadd.f32 %v1973_v38, %v657_v35  ;;  %v785_v39 = vpop.f32.mrb[21].mxu1  ;;  %v1583_v40 = vpop.f32.mrb[22].mxu0 }
 0x116   : > { %v854_v41 = vmax.f32 %v666_v33, 0.0  ;;  %v786_v42 = vadd.f32 %v1973_v38, %v785_v39  ;;  %v669_v43 = vadd.f32 %v1583_v40, %v1973_v38  ;;  %v1615_v44 = vpop.f32.mrb[22].mxu1  ;;  %v660_v45 = vpop.f32.mrb[23].mxu0 }
 0x117   : > { %v886_v46 = vmax.f32 %v794_v36, 0.0  ;;  %v852_v47 = vmax.f32 %v658_v37, 0.0  ;;  %v797_v48 = vadd.f32 %v1615_v44, %v1973_v38  ;;  %v661_v49 = vadd.f32 %v1973_v38, %v660_v45  ;;  %v788_v50 = vpop.f32.mrb[23].mxu1 }
 0x118   : > { %919 = vst.msk [vmem:[%s1982_s8 + $0xb0] sm:$0xff] %vm896_vm3, %v854_v41  ;;  %v884_v51 = vmax.f32 %v786_v42, 0.0  ;;  %v855_v52 = vmax.f32 %v669_v43, 0.0  ;;  %v789_v53 = vadd.f32 %v1973_v38, %v788_v50 }
 0x119   : > { %951 = vst.msk [vmem:[%s1982_s8 + $0x1b0] sm:$0xff] %vm896_vm3, %v886_v46  ;;  %917 = vst.msk [vmem:[%s1982_s8 + $0xa0] sm:$0xff] %vm896_vm3, %v852_v47  ;;  %v887_v54 = vmax.f32 %v797_v48, 0.0  ;;  %v853_v55 = vmax.f32 %v661_v49, 0.0 }
 0x11a   : > { %949 = vst.msk [vmem:[%s1982_s8 + $0x1a0] sm:$0xff] %vm896_vm3, %v884_v51  ;;  %920 = vst.msk [vmem:[%s1982_s8 + $0xb8] sm:$0xff] %vm896_vm3, %v855_v52  ;;  %v885_v56 = vmax.f32 %v789_v53, 0.0 }
 0x11b   : > { %952 = vst.msk [vmem:[%s1982_s8 + $0x1b8] sm:$0xff] %vm896_vm3, %v887_v54  ;;  %918 = vst.msk [vmem:[%s1982_s8 + $0xa8] sm:$0xff] %vm896_vm3, %v853_v55  ;;  %v1586_v57 = vpop.f32.mrb[24].mxu0 }
 0x11c   : > { %950 = vst.msk [vmem:[%s1982_s8 + $0x1a8] sm:$0xff] %vm896_vm3, %v885_v56  ;;  %v682_v58 = vadd.f32 %v1586_v57, %v1973_v38  ;;  %v1618_v59 = vpop.f32.mrb[24].mxu1  ;;  %v673_v60 = vpop.f32.mrb[25].mxu0 }
 0x11d   : > { %v810_v61 = vadd.f32 %v1618_v59, %v1973_v38  ;;  %v674_v62 = vadd.f32 %v1973_v38, %v673_v60  ;;  %v801_v63 = vpop.f32.mrb[25].mxu1  ;;  %v1587_v0 = vpop.f32.mrb[26].mxu0 }
 0x11e   : > { %v858_v1 = vmax.f32 %v682_v58, 0.0  ;;  %v802_v2 = vadd.f32 %v1973_v38, %v801_v63  ;;  %v685_v3 = vadd.f32 %v1587_v0, %v1973_v38  ;;  %v1619_v4 = vpop.f32.mrb[26].mxu1  ;;  %v676_v5 = vpop.f32.mrb[27].mxu0 }
 0x11f   : > { %v890_v6 = vmax.f32 %v810_v61, 0.0  ;;  %v856_v7 = vmax.f32 %v674_v62, 0.0  ;;  %v813_v8 = vadd.f32 %v1619_v4, %v1973_v38  ;;  %v677_v9 = vadd.f32 %v1973_v38, %v676_v5  ;;  %v804_v10 = vpop.f32.mrb[27].mxu1 }
 0x120   : > { %923 = vst.msk [vmem:[%s1982_s8 + $0xd0] sm:$0xff] %vm896_vm3, %v858_v1  ;;  %v888_v11 = vmax.f32 %v802_v2, 0.0  ;;  %v859_v12 = vmax.f32 %v685_v3, 0.0  ;;  %v805_v13 = vadd.f32 %v1973_v38, %v804_v10 }
 0x121   : > { %955 = vst.msk [vmem:[%s1982_s8 + $0x1d0] sm:$0xff] %vm896_vm3, %v890_v6  ;;  %921 = vst.msk [vmem:[%s1982_s8 + $0xc0] sm:$0xff] %vm896_vm3, %v856_v7  ;;  %v891_v14 = vmax.f32 %v813_v8, 0.0  ;;  %v857_v15 = vmax.f32 %v677_v9, 0.0 }
 0x122   : > { %953 = vst.msk [vmem:[%s1982_s8 + $0x1c0] sm:$0xff] %vm896_vm3, %v888_v11  ;;  %924 = vst.msk [vmem:[%s1982_s8 + $0xd8] sm:$0xff] %vm896_vm3, %v859_v12  ;;  %v889_v16 = vmax.f32 %v805_v13, 0.0 }
 0x123   : > { %956 = vst.msk [vmem:[%s1982_s8 + $0x1d8] sm:$0xff] %vm896_vm3, %v891_v14  ;;  %922 = vst.msk [vmem:[%s1982_s8 + $0xc8] sm:$0xff] %vm896_vm3, %v857_v15  ;;  %v1590_v17 = vpop.f32.mrb[28].mxu0 }
 0x124   : > { %954 = vst.msk [vmem:[%s1982_s8 + $0x1c8] sm:$0xff] %vm896_vm3, %v889_v16  ;;  %v698_v18 = vadd.f32 %v1590_v17, %v1973_v38  ;;  %v1622_v19 = vpop.f32.mrb[28].mxu1  ;;  %v689_v20 = vpop.f32.mrb[29].mxu0 }
 0x125   : > { %v826_v21 = vadd.f32 %v1622_v19, %v1973_v38  ;;  %v690_v22 = vadd.f32 %v1973_v38, %v689_v20  ;;  %v817_v23 = vpop.f32.mrb[29].mxu1  ;;  %v1591_v24 = vpop.f32.mrb[30].mxu0 }
 0x126   : > { %v862_v25 = vmax.f32 %v698_v18, 0.0  ;;  %v818_v26 = vadd.f32 %v1973_v38, %v817_v23  ;;  %v701_v27 = vadd.f32 %v1591_v24, %v1973_v38  ;;  %v1623_v28 = vpop.f32.mrb[30].mxu1  ;;  %v692_v29 = vpop.f32.mrb[31].mxu0  ;;  %967 = sbr.rel (!%p1885_p4) target bundleno = 373 (0x175), region = 36 }
 0x127   : > { %v894_v30 = vmax.f32 %v826_v21, 0.0  ;;  %v860_v31 = vmax.f32 %v690_v22, 0.0  ;;  %v829_v32 = vadd.f32 %v1623_v28, %v1973_v38  ;;  %v693_v33 = vadd.f32 %v1973_v38, %v692_v29  ;;  %v820_v34 = vpop.f32.mrb[31].mxu1 }
 0x128   : > { %927 = vst.msk [vmem:[%s1982_s8 + $0xf0] sm:$0xff] %vm896_vm3, %v862_v25  ;;  %v892_v35 = vmax.f32 %v818_v26, 0.0  ;;  %v863_v36 = vmax.f32 %v701_v27, 0.0  ;;  %v821_v37 = vadd.f32 %v1973_v38, %v820_v34 }
 0x129   : > { %959 = vst.msk [vmem:[%s1982_s8 + $0x1f0] sm:$0xff] %vm896_vm3, %v894_v30  ;;  %925 = vst.msk [vmem:[%s1982_s8 + $0xe0] sm:$0xff] %vm896_vm3, %v860_v31  ;;  %v895_v39 = vmax.f32 %v829_v32, 0.0  ;;  %v861_v40 = vmax.f32 %v693_v33, 0.0 }
 0x12a   : > { %957 = vst.msk [vmem:[%s1982_s8 + $0x1e0] sm:$0xff] %vm896_vm3, %v892_v35  ;;  %928 = vst.msk [vmem:[%s1982_s8 + $0xf8] sm:$0xff] %vm896_vm3, %v863_v36  ;;  %v893_v41 = vmax.f32 %v821_v37, 0.0 }
 0x12b   : > { %960 = vst.msk [vmem:[%s1982_s8 + $0x1f8] sm:$0xff] %vm896_vm3, %v895_v39  ;;  %926 = vst.msk [vmem:[%s1982_s8 + $0xe8] sm:$0xff] %vm896_vm3, %v861_v40 }
 0x12c   : > { %958 = vst.msk [vmem:[%s1982_s8 + $0x1e8] sm:$0xff] %vm896_vm3, %v893_v41 }
 0x12d   : > { %s2389_s9 = smov (!%p970_p8, %s969_s9), 64 }
 0x12e   : > { %s1504_s17 = sshll.u32 %s2389_s9, 7 }
 0x12f   : > { %p1507_p9 = scmp.eq.s32.totalorder %s1504_s17, 0 }
 0x130   : > { %s2182_s18 = sshrl.u32 (!%p1507_p9), %s2389_s9, 6 }
 0x131   : > { %978 = sbr.rel (%p1507_p9) target bundleno = 373 (0x175), region = 40  ;;  %p1508_p10 = scmp.le.s32.totalorder (!%p1507_p9), %s2182_s18, 0 }
 0x138   : > { %1384 = sbr.rel (%p1508_p10) target bundleno = 352 (0x160), region = 116  ;;  %s2380_s15 = smov (!%p1508_p10), %s2176_s14 }
 0x139   : > { %s2381_s20 = smov (!%p1508_p10), %s1982_s8  ;;  %s2191_s21 = smov (!%p1508_p10), 0  }
 0x13a   : > { %s2193_s22 = smov (!%p1508_p10), 0  }
 0x13f LB: >> { %v1166_v38 = vld [vmem:[%s1813_s20] sm:$0xff]  ;;  %v1168_v42 = vld [vmem:[%s1813_s20 + $0x8] sm:$0xff]  ;;  %v1170_v43 = vld [vmem:[%s1813_s20 + $0x10] sm:$0xff]  ;;  %s1294_s23 = sadd.s32 1, %s1817_s21  ;;  %s1160_s22 = sadd.s32 1, %s1821_s22   ;;  %s1821_s22 = sphi %s2193_s22, %s1160_s22   ;;  %s1817_s21 = sphi %s2191_s21, %s2384_s21   ;;  %s1813_s20 = sphi %s2381_s20, %s2383_s20   ;;  %s1809_s15 = sphi %s2380_s15, %s2382_s15  }
 0x140   : >> { %1167 = vst [vmem:[%s1809_s15] sm:$0xff] %v1166_v38  ;;  %1169 = vst [vmem:[%s1809_s15 + $0x8] sm:$0xff] %v1168_v42  ;;  %v1172_v44 = vld [vmem:[%s1813_s20 + $0x18] sm:$0xff]  ;;  %v1174_v45 = vld [vmem:[%s1813_s20 + $0x20] sm:$0xff]  ;;  %p1295_p11 = scmp.ge.s32.totalorder %s1294_s23, %s2182_s18  ;;  %p1159_p12 = scmp.ge.s32.totalorder %s1160_s22, %s2182_s18 }
 0x141   : >> { %1171 = vst [vmem:[%s1809_s15 + $0x10] sm:$0xff] %v1170_v43  ;;  %v1176_v46 = vld [vmem:[%s1813_s20 + $0x28] sm:$0xff]  ;;  %1173 = vst [vmem:[%s1809_s15 + $0x18] sm:$0xff] %v1172_v44  ;;  %v1178_v47 = vld [vmem:[%s1813_s20 + $0x30] sm:$0xff] }
 0x142   : >> { %1175 = vst [vmem:[%s1809_s15 + $0x20] sm:$0xff] %v1174_v45  ;;  %1177 = vst [vmem:[%s1809_s15 + $0x28] sm:$0xff] %v1176_v46  ;;  %v1180_v48 = vld [vmem:[%s1813_s20 + $0x38] sm:$0xff]  ;;  %v1182_v49 = vld [vmem:[%s1813_s20 + $0x40] sm:$0xff]  ;;  %s2391_s23 = smov (%p1295_p11, %s1294_s23), 0 }
 0x143   : >> { %1179 = vst [vmem:[%s1809_s15 + $0x30] sm:$0xff] %v1178_v47  ;;  %1181 = vst [vmem:[%s1809_s15 + $0x38] sm:$0xff] %v1180_v48  ;;  %v1184_v50 = vld [vmem:[%s1813_s20 + $0x48] sm:$0xff]  ;;  %v1186_v51 = vld [vmem:[%s1813_s20 + $0x50] sm:$0xff]  ;;  %s1509_s24 = sshll.u32 %s2391_s23, 9  ;;  %s2384_s21 = smov %s2391_s23 }
 0x144   : >> { %1183 = vst [vmem:[%s1809_s15 + $0x40] sm:$0xff] %v1182_v49  ;;  %v1188_v52 = vld [vmem:[%s1813_s20 + $0x58] sm:$0xff]  ;;  %1185 = vst [vmem:[%s1809_s15 + $0x48] sm:$0xff] %v1184_v50  ;;  %v1190_v53 = vld [vmem:[%s1813_s20 + $0x60] sm:$0xff]  ;;  %s2249_s25 = scalar_lea.vmem %s1982_s8, %s1509_s24 [#allocation2]   ;;  %s2252_s26 = scalar_lea.vmem %s2176_s14, %s1509_s24  }
 0x145   : >> { %1187 = vst [vmem:[%s1809_s15 + $0x50] sm:$0xff] %v1186_v51  ;;  %1189 = vst [vmem:[%s1809_s15 + $0x58] sm:$0xff] %v1188_v52  ;;  %v1192_v54 = vld [vmem:[%s1813_s20 + $0x68] sm:$0xff]  ;;  %v1194_v55 = vld [vmem:[%s1813_s20 + $0x70] sm:$0xff] }
 0x146   : >> { %1191 = vst [vmem:[%s1809_s15 + $0x60] sm:$0xff] %v1190_v53  ;;  %1193 = vst [vmem:[%s1809_s15 + $0x68] sm:$0xff] %v1192_v54  ;;  %v1196_v56 = vld [vmem:[%s1813_s20 + $0x78] sm:$0xff]  ;;  %v1198_v57 = vld [vmem:[%s1813_s20 + $0x80] sm:$0xff] }
 0x147   : >> { %1195 = vst [vmem:[%s1809_s15 + $0x70] sm:$0xff] %v1194_v55  ;;  %v1200_v58 = vld [vmem:[%s1813_s20 + $0x88] sm:$0xff]  ;;  %1197 = vst [vmem:[%s1809_s15 + $0x78] sm:$0xff] %v1196_v56  ;;  %v1202_v59 = vld [vmem:[%s1813_s20 + $0x90] sm:$0xff] }
 0x148   : >> { %1199 = vst [vmem:[%s1809_s15 + $0x80] sm:$0xff] %v1198_v57  ;;  %1201 = vst [vmem:[%s1809_s15 + $0x88] sm:$0xff] %v1200_v58  ;;  %v1204_v60 = vld [vmem:[%s1813_s20 + $0x98] sm:$0xff]  ;;  %v1206_v61 = vld [vmem:[%s1813_s20 + $0xa0] sm:$0xff] }
 0x149   : >> { %1203 = vst [vmem:[%s1809_s15 + $0x90] sm:$0xff] %v1202_v59  ;;  %1205 = vst [vmem:[%s1809_s15 + $0x98] sm:$0xff] %v1204_v60  ;;  %v1208_v62 = vld [vmem:[%s1813_s20 + $0xa8] sm:$0xff]  ;;  %v1210_v63 = vld [vmem:[%s1813_s20 + $0xb0] sm:$0xff] }
 0x14a   : >> { %1207 = vst [vmem:[%s1809_s15 + $0xa0] sm:$0xff] %v1206_v61  ;;  %v1212_v0 = vld [vmem:[%s1813_s20 + $0xb8] sm:$0xff]  ;;  %1209 = vst [vmem:[%s1809_s15 + $0xa8] sm:$0xff] %v1208_v62  ;;  %v1214_v1 = vld [vmem:[%s1813_s20 + $0xc0] sm:$0xff] }
 0x14b   : >> { %1211 = vst [vmem:[%s1809_s15 + $0xb0] sm:$0xff] %v1210_v63  ;;  %1213 = vst [vmem:[%s1809_s15 + $0xb8] sm:$0xff] %v1212_v0  ;;  %v1216_v2 = vld [vmem:[%s1813_s20 + $0xc8] sm:$0xff]  ;;  %v1218_v3 = vld [vmem:[%s1813_s20 + $0xd0] sm:$0xff] }
 0x14c   : >> { %1215 = vst [vmem:[%s1809_s15 + $0xc0] sm:$0xff] %v1214_v1  ;;  %1217 = vst [vmem:[%s1809_s15 + $0xc8] sm:$0xff] %v1216_v2  ;;  %v1220_v4 = vld [vmem:[%s1813_s20 + $0xd8] sm:$0xff]  ;;  %v1222_v5 = vld [vmem:[%s1813_s20 + $0xe0] sm:$0xff] }
 0x14d   : >> { %1219 = vst [vmem:[%s1809_s15 + $0xd0] sm:$0xff] %v1218_v3  ;;  %v1224_v6 = vld [vmem:[%s1813_s20 + $0xe8] sm:$0xff]  ;;  %1221 = vst [vmem:[%s1809_s15 + $0xd8] sm:$0xff] %v1220_v4  ;;  %v1226_v7 = vld [vmem:[%s1813_s20 + $0xf0] sm:$0xff] }
 0x14e   : >> { %1223 = vst [vmem:[%s1809_s15 + $0xe0] sm:$0xff] %v1222_v5  ;;  %1225 = vst [vmem:[%s1809_s15 + $0xe8] sm:$0xff] %v1224_v6  ;;  %v1228_v8 = vld [vmem:[%s1813_s20 + $0xf8] sm:$0xff]  ;;  %v1230_v9 = vld [vmem:[%s1813_s20 + $0x100] sm:$0xff] }
 0x14f   : >> { %1227 = vst [vmem:[%s1809_s15 + $0xf0] sm:$0xff] %v1226_v7  ;;  %1229 = vst [vmem:[%s1809_s15 + $0xf8] sm:$0xff] %v1228_v8  ;;  %v1232_v10 = vld [vmem:[%s1813_s20 + $0x108] sm:$0xff]  ;;  %v1234_v11 = vld [vmem:[%s1813_s20 + $0x110] sm:$0xff] }
 0x150   : >> { %1231 = vst [vmem:[%s1809_s15 + $0x100] sm:$0xff] %v1230_v9  ;;  %v1236_v12 = vld [vmem:[%s1813_s20 + $0x118] sm:$0xff]  ;;  %1233 = vst [vmem:[%s1809_s15 + $0x108] sm:$0xff] %v1232_v10  ;;  %v1238_v13 = vld [vmem:[%s1813_s20 + $0x120] sm:$0xff] }
 0x151   : >> { %1235 = vst [vmem:[%s1809_s15 + $0x110] sm:$0xff] %v1234_v11  ;;  %1237 = vst [vmem:[%s1809_s15 + $0x118] sm:$0xff] %v1236_v12  ;;  %v1240_v14 = vld [vmem:[%s1813_s20 + $0x128] sm:$0xff]  ;;  %v1242_v15 = vld [vmem:[%s1813_s20 + $0x130] sm:$0xff] }
 0x152   : >> { %1239 = vst [vmem:[%s1809_s15 + $0x120] sm:$0xff] %v1238_v13  ;;  %1241 = vst [vmem:[%s1809_s15 + $0x128] sm:$0xff] %v1240_v14  ;;  %v1244_v16 = vld [vmem:[%s1813_s20 + $0x138] sm:$0xff]  ;;  %v1246_v17 = vld [vmem:[%s1813_s20 + $0x140] sm:$0xff] }
 0x153   : >> { %1243 = vst [vmem:[%s1809_s15 + $0x130] sm:$0xff] %v1242_v15  ;;  %v1248_v18 = vld [vmem:[%s1813_s20 + $0x148] sm:$0xff]  ;;  %1245 = vst [vmem:[%s1809_s15 + $0x138] sm:$0xff] %v1244_v16  ;;  %v1250_v19 = vld [vmem:[%s1813_s20 + $0x150] sm:$0xff] }
 0x154   : >> { %1247 = vst [vmem:[%s1809_s15 + $0x140] sm:$0xff] %v1246_v17  ;;  %1249 = vst [vmem:[%s1809_s15 + $0x148] sm:$0xff] %v1248_v18  ;;  %v1252_v20 = vld [vmem:[%s1813_s20 + $0x158] sm:$0xff]  ;;  %v1254_v21 = vld [vmem:[%s1813_s20 + $0x160] sm:$0xff] }
 0x155   : >> { %1251 = vst [vmem:[%s1809_s15 + $0x150] sm:$0xff] %v1250_v19  ;;  %1253 = vst [vmem:[%s1809_s15 + $0x158] sm:$0xff] %v1252_v20  ;;  %v1256_v22 = vld [vmem:[%s1813_s20 + $0x168] sm:$0xff]  ;;  %v1258_v23 = vld [vmem:[%s1813_s20 + $0x170] sm:$0xff] }
 0x156   : >> { %1255 = vst [vmem:[%s1809_s15 + $0x160] sm:$0xff] %v1254_v21  ;;  %v1260_v24 = vld [vmem:[%s1813_s20 + $0x178] sm:$0xff]  ;;  %1257 = vst [vmem:[%s1809_s15 + $0x168] sm:$0xff] %v1256_v22  ;;  %v1262_v25 = vld [vmem:[%s1813_s20 + $0x180] sm:$0xff] }
 0x157   : >> { %1259 = vst [vmem:[%s1809_s15 + $0x170] sm:$0xff] %v1258_v23  ;;  %1261 = vst [vmem:[%s1809_s15 + $0x178] sm:$0xff] %v1260_v24  ;;  %v1264_v26 = vld [vmem:[%s1813_s20 + $0x188] sm:$0xff]  ;;  %v1266_v27 = vld [vmem:[%s1813_s20 + $0x190] sm:$0xff] }
 0x158   : >> { %1263 = vst [vmem:[%s1809_s15 + $0x180] sm:$0xff] %v1262_v25  ;;  %1265 = vst [vmem:[%s1809_s15 + $0x188] sm:$0xff] %v1264_v26  ;;  %v1268_v28 = vld [vmem:[%s1813_s20 + $0x198] sm:$0xff]  ;;  %v1270_v29 = vld [vmem:[%s1813_s20 + $0x1a0] sm:$0xff] }
 0x159   : >> { %1267 = vst [vmem:[%s1809_s15 + $0x190] sm:$0xff] %v1266_v27  ;;  %v1272_v30 = vld [vmem:[%s1813_s20 + $0x1a8] sm:$0xff]  ;;  %1269 = vst [vmem:[%s1809_s15 + $0x198] sm:$0xff] %v1268_v28  ;;  %v1274_v31 = vld [vmem:[%s1813_s20 + $0x1b0] sm:$0xff]  ;;  %1162 = sbr.rel (!%p1159_p12) target bundleno = 319 (0x13f), region = 122 }
 0x15a   : >> { %1271 = vst [vmem:[%s1809_s15 + $0x1a0] sm:$0xff] %v1270_v29  ;;  %1273 = vst [vmem:[%s1809_s15 + $0x1a8] sm:$0xff] %v1272_v30  ;;  %v1276_v32 = vld [vmem:[%s1813_s20 + $0x1b8] sm:$0xff]  ;;  %v1278_v33 = vld [vmem:[%s1813_s20 + $0x1c0] sm:$0xff] }
 0x15b   : >> { %1275 = vst [vmem:[%s1809_s15 + $0x1b0] sm:$0xff] %v1274_v31  ;;  %1277 = vst [vmem:[%s1809_s15 + $0x1b8] sm:$0xff] %v1276_v32  ;;  %v1280_v34 = vld [vmem:[%s1813_s20 + $0x1c8] sm:$0xff]  ;;  %v1282_v35 = vld [vmem:[%s1813_s20 + $0x1d0] sm:$0xff] }
 0x15c   : >> { %1279 = vst [vmem:[%s1809_s15 + $0x1c0] sm:$0xff] %v1278_v33  ;;  %v1284_v36 = vld [vmem:[%s1813_s20 + $0x1d8] sm:$0xff]  ;;  %1281 = vst [vmem:[%s1809_s15 + $0x1c8] sm:$0xff] %v1280_v34  ;;  %v1286_v37 = vld [vmem:[%s1813_s20 + $0x1e0] sm:$0xff] }
 0x15d   : >> { %1283 = vst [vmem:[%s1809_s15 + $0x1d0] sm:$0xff] %v1282_v35  ;;  %1285 = vst [vmem:[%s1809_s15 + $0x1d8] sm:$0xff] %v1284_v36  ;;  %v1288_v39 = vld [vmem:[%s1813_s20 + $0x1e8] sm:$0xff]  ;;  %v1290_v40 = vld [vmem:[%s1813_s20 + $0x1f0] sm:$0xff] }
 0x15e   : >> { %1287 = vst [vmem:[%s1809_s15 + $0x1e0] sm:$0xff] %v1286_v37  ;;  %1289 = vst [vmem:[%s1809_s15 + $0x1e8] sm:$0xff] %v1288_v39  ;;  %v1292_v41 = vld [vmem:[%s1813_s20 + $0x1f8] sm:$0xff]  ;;  %s2383_s20 = smov %s2249_s25 }
 0x15f   : >> { %1291 = vst [vmem:[%s1809_s15 + $0x1f0] sm:$0xff] %v1290_v40  ;;  %1293 = vst [vmem:[%s1809_s15 + $0x1f8] sm:$0xff] %v1292_v41  ;;  %s2382_s15 = smov %s2252_s26 }
 0x160 PF: > { %s2357_s27 = sand.u32 63, %s2389_s9   ;;  %s1520_s28 = sshll.u32 %s2182_s18, 9 }
 0x161   : > { %s1305_s29 = scalar_lea.vmem %s1982_s8, %s1520_s28 [#allocation2]   ;;  %s1307_s30 = scalar_lea.vmem %s2176_s14, %s1520_s28  }
 0x162   : > { %p1514_p13 = scmp.le.s32.totalorder %s2357_s27, 0 }
 0x163   : > { %s1823_s4 = smov (!%p1514_p13), %s1307_s30   ;;  %s1827_s5 = smov (!%p1514_p13), %s1305_s29  }
 0x164   : > { %1398 = sbr.rel (%p1514_p13) target bundleno = 373 (0x175), region = 127  ;;  %s1831_s6 = smov (!%p1514_p13), 0  }
 0x165   : > { %s1835_s7 = smov (!%p1514_p13), 0  }
 0x16b LB: >> { %v1317_v38 = vld [vmem:[%s1829_s5] sm:$0xff]  ;;  %s1319_s9 = sadd.s32 1, %s1833_s6  ;;  %s1311_s7 = sadd.s32 1, %s1837_s7   ;;  %s1837_s7 = sphi %s1835_s7, %s1311_s7   ;;  %s1833_s6 = sphi %s1831_s6, %s1832_s6   ;;  %s1829_s5 = sphi %s1827_s5, %s1324_s5   ;;  %s1825_s4 = sphi %s1823_s4, %s1325_s4  }
 0x16c   : >> { %1318 = vst [vmem:[%s1825_s4] sm:$0xff] %v1317_v38  ;;  %p1320_p0 = scmp.ge.s32.totalorder %s1319_s9, %s2357_s27  ;;  %p1310_p1 = scmp.ge.s32.totalorder %s1311_s7, %s2357_s27 }
 0x16e   : >> { %s2393_s9 = smov (%p1320_p0, %s1319_s9), 0  ;;  %1313 = sbr.rel (!%p1310_p1) target bundleno = 363 (0x16b), region = 133 }
 0x16f   : >> { %s1515_s8 = sshll.u32 %s2393_s9, 3  ;;  %s1832_s6 = smov %s2393_s9  }
 0x170   : >> { %s1324_s5 = scalar_lea.vmem %s1305_s29, %s1515_s8 [#allocation2]   ;;  %s1325_s4 = scalar_lea.vmem %s1307_s30, %s1515_s8  }
 0x175 PF: > { %p10_p2 = scmp.ge.s32.totalorder %s1875_s16, 5   ;;  %s2385_s12 = smov %s1801_s13 }
 0x176   : > { %s2386_s13 = smov %s1883_s19  ;;  %s2387_s14 = smov %s1875_s16 }
 0x177   :  { %12 = sbr.rel (!%p10_p2) target bundleno = 2 (0x2), region = 144 }

// kernel: lenet_forward.7
= control target key start
LH: loop header
LB: loop body
LE: loop exit
PB: predicated region body
PF: predicated region fallthrough
CT: control target
= control target key end

     0   :  { %vm237_vm0 = vcmask 998400   ;;  %vm262_vm1 = vcmask 1044480   ;;  %vm379_vm2 = vcmask 162816   ;;  %s772_s1 = inlined_call_operand.vmem [shape: bf16[250,20], index: 1, kind: input, shape index: {}]   ;;  %s773_s0 = inlined_call_operand.vmem [shape: bf16[128,250], index: 0, kind: input, shape index: {}]   ;;  %s774_s2 = inlined_call_operand.vmem [shape: f32[1,20], index: 2, kind: input, shape index: {}]   ;;  %s775_s3 = inlined_call_operand.vmem [shape: f32[128,20], index: 3, kind: output, shape index: {}]  }
   0x1   :  { %v523_v0 = vld [vmem:[%s772_s1 + $0x40] sm:$0xff]   ;;  %v525_v2 = vld [vmem:[%s772_s1 + $0x48] sm:$0xff]   ;;  %v527_v4 = vld [vmem:[%s772_s1 + $0x50] sm:$0xff]  }
   0x2   :  { %v524_v1 = vld [vmem:[%s772_s1] sm:$0xff]   ;;  %441 = vmatprep.subr.bf16.mxu0 %v523_v0  ;;  %505 = vmatprep.subr.bf16.mxu1 %v523_v0  ;;  %v526_v3 = vld [vmem:[%s772_s1 + $0x8] sm:$0xff]   ;;  %v528_v5 = vld [vmem:[%s772_s1 + $0x10] sm:$0xff]  }
   0x3   :  { %442 = vmatpush3.bf16.msra.mxu0 %v524_v1  ;;  %513 = vmatpush3.bf16.msra.mxu1 %v524_v1  ;;  %v529_v6 = vld [vmem:[%s772_s1 + $0x58] sm:$0xff]   ;;  %v531_v8 = vld [vmem:[%s772_s1 + $0x60] sm:$0xff]   ;;  %v533_v10 = vld [vmem:[%s772_s1 + $0x68] sm:$0xff]  }
   0x4   :  { %443 = vmatprep.subr.bf16.mxu0 %v525_v2  ;;  %506 = vmatprep.subr.bf16.mxu1 %v525_v2  ;;  %v530_v7 = vld [vmem:[%s772_s1 + $0x18] sm:$0xff]   ;;  %v532_v9 = vld [vmem:[%s772_s1 + $0x20] sm:$0xff]   ;;  %v534_v13 = vld [vmem:[%s772_s1 + $0x28] sm:$0xff]  }
   0x5   :  { %v541_v11 = vld [vmem:[%s773_s0 + $0x4] ss:$8 sps:$4 sm:$0xff]   ;;  %v535_v14 = vld [vmem:[%s772_s1 + $0x70] sm:$0xff]   ;;  %v537_v16 = vld [vmem:[%s772_s1 + $0x78] sm:$0x1f]  }
   0x6   :  { %v544_v12 = vld [vmem:[%s773_s0 + $0x44] ss:$8 sps:$4 sm:$0xff]   ;;  %433 = vmatprep.mubr.msk.bf16.mxu0 %vm237_vm0, %v541_v11  ;;  %v536_v15 = vld [vmem:[%s772_s1 + $0x30] sm:$0xff]   ;;  %v538_v17 = vld [vmem:[%s772_s1 + $0x38] sm:$0xff]  }
   0x7   :  { %444 = vmatpush3.bf16.msra.mxu0 %v526_v3  ;;  %514 = vmatpush3.bf16.msra.mxu1 %v526_v3  ;;  %v539_v18 = vld [vmem:[%s773_s0] ss:$8 sps:$4 sm:$0xff]   ;;  %v545_v20 = vld [vmem:[%s773_s0 + $0x14] ss:$8 sps:$4 sm:$0xff]   ;;  %v549_v22 = vld [vmem:[%s773_s0 + $0x10] ss:$8 sps:$4 sm:$0xff]  }
   0x8   :  { %445 = vmatprep.subr.bf16.mxu0 %v527_v4  ;;  %507 = vmatprep.subr.bf16.mxu1 %v527_v4  ;;  %v542_v19 = vld [vmem:[%s773_s0 + $0x40] ss:$8 sps:$4 sm:$0xff]   ;;  %v547_v21 = vld [vmem:[%s773_s0 + $0x54] ss:$8 sps:$4 sm:$0xff]   ;;  %v550_v23 = vld [vmem:[%s773_s0 + $0x50] ss:$8 sps:$4 sm:$0xff]  }
   0x9   :  { %437 = vmatprep.mubr.msk.bf16.mxu1 %vm237_vm0, %v544_v12  ;;  %v551_v24 = vld [vmem:[%s773_s0 + $0x24] ss:$8 sps:$4 sm:$0xff]   ;;  %v555_v26 = vld [vmem:[%s773_s0 + $0x20] ss:$8 sps:$4 sm:$0xff]   ;;  %v557_v28 = vld [vmem:[%s773_s0 + $0x34] ss:$8 sps:$4 sm:$0xff]  }
   0xa   :  { %v553_v25 = vld [vmem:[%s773_s0 + $0x64] ss:$8 sps:$4 sm:$0xff]   ;;  %v556_v27 = vld [vmem:[%s773_s0 + $0x60] ss:$8 sps:$4 sm:$0xff]   ;;  %v559_v29 = vld [vmem:[%s773_s0 + $0x74] ss:$8 sps:$4 sm:$0xff]  }
   0xb   :  { %446 = vmatpush3.bf16.msra.mxu0 %v528_v5  ;;  %515 = vmatpush3.bf16.msra.mxu1 %v528_v5  ;;  %v561_v30 = vld [vmem:[%s773_s0 + $0x30] ss:$8 sps:$4 sm:$0xff]   ;;  %v690_v34 = vld [vmem:[%s774_s2] ss:$0 sm:$0xff] }
   0xc   :  { %447 = vmatprep.subr.bf16.mxu0 %v529_v6  ;;  %508 = vmatprep.subr.bf16.mxu1 %v529_v6  ;;  %v562_v31 = vld [vmem:[%s773_s0 + $0x70] ss:$8 sps:$4 sm:$0xff]  }
   0xf   :  { %448 = vmatpush3.bf16.msra.mxu0 %v530_v7  ;;  %516 = vmatpush3.bf16.msra.mxu1 %v530_v7 }
  0x10   :  { %449 = vmatprep.subr.bf16.mxu0 %v531_v8  ;;  %509 = vmatprep.subr.bf16.mxu1 %v531_v8 }
  0x13   :  { %450 = vmatpush3.bf16.msra.mxu0 %v532_v9  ;;  %517 = vmatpush3.bf16.msra.mxu1 %v532_v9 }
  0x14   :  { %451 = vmatprep.subr.bf16.mxu0 %v533_v10  ;;  %510 = vmatprep.subr.bf16.mxu1 %v533_v10 }
  0x17   :  { %452 = vmatpush3.bf16.msra.mxu0 %v534_v13  ;;  %518 = vmatpush3.bf16.msra.mxu1 %v534_v13 }
  0x18   :  { %453 = vmatprep.subr.bf16.mxu0 %v535_v14  ;;  %511 = vmatprep.subr.bf16.mxu1 %v535_v14 }
  0x1b   :  { %454 = vmatpush3.bf16.msra.mxu0 %v536_v15  ;;  %519 = vmatpush3.bf16.msra.mxu1 %v536_v15 }
  0x1c   :  { %521 = vmatprep.subr.msk.bf16.mxu0 %vm262_vm1, %v537_v16  ;;  %522 = vmatprep.subr.msk.bf16.mxu1 %vm262_vm1, %v537_v16 }
  0x1f   :  { %456 = vmatpush3.bf16.msra.mxu0 %v538_v17  ;;  %520 = vmatpush3.bf16.msra.mxu1 %v538_v17 }
  0x22   :  { %299 = vmatmul.mubr.bf16.vlgmr.msra.gmra.mrb[0].mxu0 %v539_v18  ;;  %331 = vmatmul.mubr.bf16.vlgmr.msra.gmra.mrb[0].mxu1 %v542_v19 }
  0x23   :  { %434 = vmatprep.mubr.msk.bf16.mxu0 %vm237_vm0, %v545_v20  ;;  %438 = vmatprep.mubr.msk.bf16.mxu1 %vm237_vm0, %v547_v21 }
  0x2a   :  { %307 = vmatmul.mubr.bf16.gmra.mrb[4].mxu0 %v549_v22  ;;  %339 = vmatmul.mubr.bf16.gmra.mrb[4].mxu1 %v550_v23 }
  0x2b   :  { %435 = vmatprep.mubr.msk.bf16.mxu0 %vm237_vm0, %v551_v24  ;;  %439 = vmatprep.mubr.msk.bf16.mxu1 %vm237_vm0, %v553_v25 }
  0x32   :  { %315 = vmatmul.mubr.bf16.gmra.mrb[8].mxu0 %v555_v26  ;;  %347 = vmatmul.mubr.bf16.gmra.mrb[8].mxu1 %v556_v27 }
  0x33   :  { %436 = vmatprep.mubr.msk.bf16.mxu0 %vm237_vm0, %v557_v28  ;;  %440 = vmatprep.mubr.msk.bf16.mxu1 %vm237_vm0, %v559_v29 }
  0x3a   :  { %323 = vmatmul.mubr.bf16.gmra.mrb[12].mxu0 %v561_v30  ;;  %355 = vmatmul.mubr.bf16.gmra.mrb[12].mxu1 %v562_v31 }
  0xf5   :  { %v457_v32 = vpop.f32.mrb[0].mxu0  ;;  %v481_v33 = vpop.f32.mrb[0].mxu1 }
  0xf6   :  { %v458_v35 = vpop.f32.mrb[1].mxu0  ;;  %v482_v36 = vpop.f32.mrb[1].mxu1 }
  0xf7   :  { %v459_v37 = vadd.f32 %v458_v35, %v457_v32  ;;  %v483_v38 = vadd.f32 %v482_v36, %v481_v33  ;;  %v460_v39 = vpop.f32.mrb[2].mxu0  ;;  %v484_v40 = vpop.f32.mrb[2].mxu1 }
  0xf8   :  { %v461_v41 = vpop.f32.mrb[3].mxu0  ;;  %v485_v42 = vpop.f32.mrb[3].mxu1 }
  0xf9   :  { %v301_v43 = vadd.f32 %v459_v37, %v690_v34  ;;  %v333_v44 = vadd.f32 %v483_v38, %v690_v34  ;;  %v462_v45 = vadd.f32 %v461_v41, %v460_v39  ;;  %v486_v46 = vadd.f32 %v485_v42, %v484_v40 }
  0xfb   :  { %v363_v47 = vmax.f32 %v301_v43, 0.0  ;;  %v371_v48 = vmax.f32 %v333_v44, 0.0  ;;  %v304_v49 = vadd.f32 %v462_v45, %v690_v34  ;;  %v336_v50 = vadd.f32 %v486_v46, %v690_v34 }
  0xfd   :  { %380 = vst.msk [vmem:[%s775_s3] sm:$0xff] %vm379_vm2, %v363_v47  ;;  %388 = vst.msk [vmem:[%s775_s3 + $0x40] sm:$0xff] %vm379_vm2, %v371_v48  ;;  %v364_v51 = vmax.f32 %v304_v49, 0.0  ;;  %v372_v52 = vmax.f32 %v336_v50, 0.0  ;;  %v463_v53 = vpop.f32.mrb[4].mxu0  ;;  %v487_v54 = vpop.f32.mrb[4].mxu1 }
  0xfe   :  { %v464_v55 = vpop.f32.mrb[5].mxu0  ;;  %v488_v56 = vpop.f32.mrb[5].mxu1 }
  0xff   :  { %381 = vst.msk [vmem:[%s775_s3 + $0x8] sm:$0xff] %vm379_vm2, %v364_v51  ;;  %389 = vst.msk [vmem:[%s775_s3 + $0x48] sm:$0xff] %vm379_vm2, %v372_v52  ;;  %v465_v57 = vadd.f32 %v464_v55, %v463_v53  ;;  %v489_v58 = vadd.f32 %v488_v56, %v487_v54  ;;  %v466_v59 = vpop.f32.mrb[6].mxu0  ;;  %v490_v60 = vpop.f32.mrb[6].mxu1 }
 0x100   :  { %v467_v61 = vpop.f32.mrb[7].mxu0  ;;  %v491_v62 = vpop.f32.mrb[7].mxu1 }
 0x101   :  { %v309_v63 = vadd.f32 %v465_v57, %v690_v34  ;;  %v341_v0 = vadd.f32 %v489_v58, %v690_v34  ;;  %v468_v1 = vadd.f32 %v467_v61, %v466_v59  ;;  %v492_v2 = vadd.f32 %v491_v62, %v490_v60 }
 0x103   :  { %v365_v3 = vmax.f32 %v309_v63, 0.0  ;;  %v373_v4 = vmax.f32 %v341_v0, 0.0  ;;  %v312_v5 = vadd.f32 %v468_v1, %v690_v34  ;;  %v344_v6 = vadd.f32 %v492_v2, %v690_v34 }
 0x105   :  { %382 = vst.msk [vmem:[%s775_s3 + $0x10] sm:$0xff] %vm379_vm2, %v365_v3  ;;  %390 = vst.msk [vmem:[%s775_s3 + $0x50] sm:$0xff] %vm379_vm2, %v373_v4  ;;  %v366_v7 = vmax.f32 %v312_v5, 0.0  ;;  %v374_v8 = vmax.f32 %v344_v6, 0.0  ;;  %v469_v9 = vpop.f32.mrb[8].mxu0  ;;  %v493_v10 = vpop.f32.mrb[8].mxu1 }
 0x106   :  { %v470_v11 = vpop.f32.mrb[9].mxu0  ;;  %v494_v12 = vpop.f32.mrb[9].mxu1 }
 0x107   :  { %383 = vst.msk [vmem:[%s775_s3 + $0x18] sm:$0xff] %vm379_vm2, %v366_v7  ;;  %391 = vst.msk [vmem:[%s775_s3 + $0x58] sm:$0xff] %vm379_vm2, %v374_v8  ;;  %v471_v13 = vadd.f32 %v470_v11, %v469_v9  ;;  %v495_v14 = vadd.f32 %v494_v12, %v493_v10  ;;  %v472_v15 = vpop.f32.mrb[10].mxu0  ;;  %v496_v16 = vpop.f32.mrb[10].mxu1 }
 0x108   :  { %v473_v17 = vpop.f32.mrb[11].mxu0  ;;  %v497_v18 = vpop.f32.mrb[11].mxu1 }
 0x109   :  { %v317_v19 = vadd.f32 %v471_v13, %v690_v34  ;;  %v349_v20 = vadd.f32 %v495_v14, %v690_v34  ;;  %v474_v21 = vadd.f32 %v473_v17, %v472_v15  ;;  %v498_v22 = vadd.f32 %v497_v18, %v496_v16 }
 0x10b   :  { %v367_v23 = vmax.f32 %v317_v19, 0.0  ;;  %v375_v24 = vmax.f32 %v349_v20, 0.0  ;;  %v320_v25 = vadd.f32 %v474_v21, %v690_v34  ;;  %v352_v26 = vadd.f32 %v498_v22, %v690_v34 }
 0x10d   :  { %384 = vst.msk [vmem:[%s775_s3 + $0x20] sm:$0xff] %vm379_vm2, %v367_v23  ;;  %392 = vst.msk [vmem:[%s775_s3 + $0x60] sm:$0xff] %vm379_vm2, %v375_v24  ;;  %v368_v27 = vmax.f32 %v320_v25, 0.0  ;;  %v376_v28 = vmax.f32 %v352_v26, 0.0  ;;  %v475_v29 = vpop.f32.mrb[12].mxu0  ;;  %v499_v30 = vpop.f32.mrb[12].mxu1 }
 0x10e   :  { %v476_v31 = vpop.f32.mrb[13].mxu0  ;;  %v500_v32 = vpop.f32.mrb[13].mxu1 }
 0x10f   :  { %385 = vst.msk [vmem:[%s775_s3 + $0x28] sm:$0xff] %vm379_vm2, %v368_v27  ;;  %393 = vst.msk [vmem:[%s775_s3 + $0x68] sm:$0xff] %vm379_vm2, %v376_v28  ;;  %v477_v33 = vadd.f32 %v476_v31, %v475_v29  ;;  %v501_v35 = vadd.f32 %v500_v32, %v499_v30  ;;  %v478_v36 = vpop.f32.mrb[14].mxu0  ;;  %v502_v37 = vpop.f32.mrb[14].mxu1 }
 0x110   :  { %v479_v38 = vpop.f32.mrb[15].mxu0  ;;  %v503_v39 = vpop.f32.mrb[15].mxu1 }
 0x111   :  { %v325_v40 = vadd.f32 %v477_v33, %v690_v34  ;;  %v357_v41 = vadd.f32 %v501_v35, %v690_v34  ;;  %v480_v42 = vadd.f32 %v479_v38, %v478_v36  ;;  %v504_v43 = vadd.f32 %v503_v39, %v502_v37 }
 0x113   :  { %v369_v44 = vmax.f32 %v325_v40, 0.0  ;;  %v377_v45 = vmax.f32 %v357_v41, 0.0  ;;  %v328_v46 = vadd.f32 %v480_v42, %v690_v34  ;;  %v360_v47 = vadd.f32 %v504_v43, %v690_v34 }
 0x115   :  { %386 = vst.msk [vmem:[%s775_s3 + $0x30] sm:$0xff] %vm379_vm2, %v369_v44  ;;  %394 = vst.msk [vmem:[%s775_s3 + $0x70] sm:$0xff] %vm379_vm2, %v377_v45  ;;  %v370_v48 = vmax.f32 %v328_v46, 0.0  ;;  %v378_v49 = vmax.f32 %v360_v47, 0.0 }
 0x117   :  { %387 = vst.msk [vmem:[%s775_s3 + $0x38] sm:$0xff] %vm379_vm2, %v370_v48  ;;  %395 = vst.msk [vmem:[%s775_s3 + $0x78] sm:$0xff] %vm379_vm2, %v378_v49 }

// kernel: lenet_forward.8
= control target key start
LH: loop header
LB: loop body
LE: loop exit
PB: predicated region body
PF: predicated region fallthrough
CT: control target
= control target key end

     0   :  { %s86_s22 = smov 108   ;;  %vm72_vm0 = vcmask 158720   ;;  %s177_s0 = inlined_call_operand.vmem [shape: f32[8,2,4,40], index: 0, kind: input, shape index: {}]   ;;  %s178_s1 = inlined_call_operand.vmem [shape: f32[8,4,20], index: 1, kind: output, shape index: {}]  }
   0x1   :  { %v12_v0 = vld [vmem:[%s177_s0 + $0x10] sm:$0xf]  ;;  %v13_v1 = vld [vmem:[%s177_s0 + $0x14] sm:$0xf]  ;;  %v8_v2 = vld [vmem:[%s177_s0] sm:$0xf] }
   0x2   :  { %v26_v3 = vmax.f32 %v12_v0, %v13_v1  ;;  %v9_v4 = vld [vmem:[%s177_s0 + $0x4] sm:$0xf]  ;;  %v14_v5 = vld [vmem:[%s177_s0 + $0x18] sm:$0xf]  ;;  %v15_v6 = vld [vmem:[%s177_s0 + $0x1c] sm:$0xf] }
   0x3   :  { %v24_v7 = vmax.f32 %v8_v2, %v9_v4  ;;  %v10_v8 = vld [vmem:[%s177_s0 + $0x8] sm:$0xf]  ;;  %v11_v9 = vld [vmem:[%s177_s0 + $0xc] sm:$0xf]  ;;  %v27_v10 = vmax.f32 %v14_v5, %v15_v6  ;;  %v16_v14 = vld [vmem:[%s177_s0 + $0x20] sm:$0xf] }
   0x4   :  { %44 = vrot.lane.b32.xlu1 %v26_v3, %s86_s22  ;;  %v25_v11 = vmax.f32 %v10_v8, %v11_v9  ;;  %v18_v12 = vld [vmem:[%s177_s0 + $0x28] sm:$0xf]  ;;  %v19_v13 = vld [vmem:[%s177_s0 + $0x2c] sm:$0xf]  ;;  %v17_v15 = vld [vmem:[%s177_s0 + $0x24] sm:$0xf] }
   0x5   :  { %40 = vrot.lane.b32.xlu0 %v24_v7, %s86_s22  ;;  %v29_v16 = vmax.f32 %v18_v12, %v19_v13  ;;  %v28_v17 = vmax.f32 %v16_v14, %v17_v15  ;;  %v22_v18 = vld [vmem:[%s177_s0 + $0x38] sm:$0xf]  ;;  %v23_v19 = vld [vmem:[%s177_s0 + $0x3c] sm:$0xf]  ;;  %v20_v20 = vld [vmem:[%s177_s0 + $0x30] sm:$0xf] }
   0x6   :  { %v21_v21 = vld [vmem:[%s177_s0 + $0x34] sm:$0xf]  ;;  %v31_v22 = vmax.f32 %v22_v18, %v23_v19 }
   0x7   :  { %v30_v23 = vmax.f32 %v20_v20, %v21_v21 }
   0x8   :  { %46 = vrot.lane.b32.xlu1 %v27_v10, %s86_s22 }
   0x9   :  { %42 = vrot.lane.b32.xlu0 %v25_v11, %s86_s22 }
   0xc   :  { %50 = vrot.lane.b32.xlu1 %v29_v16, %s86_s22 }
   0xd   :  { %48 = vrot.lane.b32.xlu0 %v28_v17, %s86_s22 }
  0x10   :  { %54 = vrot.lane.b32.xlu1 %v31_v22, %s86_s22 }
  0x11   :  { %52 = vrot.lane.b32.xlu0 %v30_v23, %s86_s22 }
  0x76   :  { %v45_v24 = vpop.permute.xlu1 %44 }
  0x77   :  { %v66_v25 = vmax.f32 %v26_v3, %v45_v24  ;;  %v41_v26 = vpop.permute.xlu0 %40 }
  0x78   :  { %v64_v27 = vmax.f32 %v24_v7, %v41_v26 }
  0x79   :  { %75 = vst.msk [vmem:[%s178_s1 + $0x8] sm:$0xf] %vm72_vm0, %v66_v25 }
  0x7a   :  { %73 = vst.msk [vmem:[%s178_s1] sm:$0xf] %vm72_vm0, %v64_v27  ;;  %v47_v28 = vpop.permute.xlu1 %46 }
  0x7b   :  { %v67_v29 = vmax.f32 %v27_v10, %v47_v28  ;;  %v43_v30 = vpop.permute.xlu0 %42 }
  0x7c   :  { %v65_v31 = vmax.f32 %v25_v11, %v43_v30 }
  0x7d   :  { %76 = vst.msk [vmem:[%s178_s1 + $0xc] sm:$0xf] %vm72_vm0, %v67_v29 }
  0x7e   :  { %74 = vst.msk [vmem:[%s178_s1 + $0x4] sm:$0xf] %vm72_vm0, %v65_v31  ;;  %v51_v32 = vpop.permute.xlu1 %50 }
  0x7f   :  { %v69_v33 = vmax.f32 %v29_v16, %v51_v32  ;;  %v49_v34 = vpop.permute.xlu0 %48 }
  0x80   :  { %v68_v35 = vmax.f32 %v28_v17, %v49_v34 }
  0x81   :  { %78 = vst.msk [vmem:[%s178_s1 + $0x14] sm:$0xf] %vm72_vm0, %v69_v33 }
  0x82   :  { %77 = vst.msk [vmem:[%s178_s1 + $0x10] sm:$0xf] %vm72_vm0, %v68_v35  ;;  %v55_v36 = vpop.permute.xlu1 %54 }
  0x83   :  { %v71_v37 = vmax.f32 %v31_v22, %v55_v36  ;;  %v53_v38 = vpop.permute.xlu0 %52 }
  0x84   :  { %v70_v39 = vmax.f32 %v30_v23, %v53_v38 }
  0x85   :  { %80 = vst.msk [vmem:[%s178_s1 + $0x1c] sm:$0xf] %vm72_vm0, %v71_v37 }
  0x86   :  { %79 = vst.msk [vmem:[%s178_s1 + $0x18] sm:$0xf] %vm72_vm0, %v70_v39 }

// kernel: lenet_forward.9
= control target key start
LH: loop header
LB: loop body
LE: loop exit
PB: predicated region body
PF: predicated region fallthrough
CT: control target
= control target key end

     0   :  { %v555_v2 = vmov 0.0   ;;  %vm556_vm0 = vmmov 0   ;;  %v82_v15 = vlaneseq  ;;  %v557_v19 = vmov 1966171168   ;;  %s697_s0 = inlined_call_operand.vmem [shape: bf16[2,320], index: 0, kind: input, shape index: {}]   ;;  %s698_s1 = inlined_call_operand.vmem [shape: bf16[320,50], index: 1, kind: input, shape index: {}]   ;;  %s699_s2 = inlined_call_operand.vmem [shape: f32[1,50], index: 2, kind: input, shape index: {}]   ;;  %s700_s3 = inlined_call_operand.vmem [shape: bf16[50,10], index: 3, kind: input, shape index: {}]   ;;  %s701_s4 = inlined_call_operand.vmem [shape: f32[1,10], index: 4, kind: input, shape index: {}]   ;;  %s702_s5 = inlined_call_operand.hbm [shape: f32[2,10], index: 5, kind: output, shape index: {}]  }
   0x1   :  { %v503_v0 = vld [vmem:[%s698_s1 + $0x40] sm:$0xff]   ;;  %475 = vmatprep.subr.bf16.mxu1 %v555_v2  ;;  %v505_v3 = vld [vmem:[%s698_s1 + $0x48] sm:$0xff]   ;;  %483 = vmatprep.mubr.msk.bf16.mxu1 %vm556_vm0, %v555_v2  ;;  %v507_v5 = vld [vmem:[%s698_s1 + $0x50] sm:$0xff]   ;;  %v80_v20 = vunpack.c.l.s4 %v557_v19 }
   0x2   :  { %v504_v1 = vld [vmem:[%s698_s1] sm:$0xff]   ;;  %443 = vmatprep.subr.bf16.mxu0 %v503_v0  ;;  %v506_v4 = vld [vmem:[%s698_s1 + $0x8] sm:$0xff]   ;;  %v508_v6 = vld [vmem:[%s698_s1 + $0x10] sm:$0xff]   ;;  %v83_v21 = vshrl.u32 %v82_v15, 7 }
   0x3   :  { %444 = vmatpush3.bf16.msra.mxu0 %v504_v1  ;;  %v509_v7 = vld [vmem:[%s698_s1 + $0x58] sm:$0xff]   ;;  %v513_v8 = vld [vmem:[%s698_s1 + $0x80] sm:$0xff]   ;;  %v516_v11 = vld [vmem:[%s698_s1 + $0x88] sm:$0xff]   ;;  %v81_v25 = vunpack.c.0.s8 %v80_v20 }
   0x4   :  { %445 = vmatprep.subr.bf16.mxu0 %v505_v3  ;;  %v510_v9 = vld [vmem:[%s698_s1 + $0x18] sm:$0xff]   ;;  %v511_v10 = vld [vmem:[%s698_s1 + $0x60] sm:$0xff]   ;;  %476 = vmatpush3.bf16.msra.mxu1 %v513_v8  ;;  %v514_v13 = vld [vmem:[%s698_s1 + $0x68] sm:$0xff]  }
   0x5   :  { %477 = vmatprep.subr.bf16.mxu1 %v555_v2  ;;  %v512_v12 = vld [vmem:[%s698_s1 + $0x20] sm:$0xff]   ;;  %v519_v14 = vld [vmem:[%s698_s1 + $0x90] sm:$0xff]   ;;  %v515_v16 = vld [vmem:[%s698_s1 + $0x28] sm:$0xff]  }
   0x6   :  { %v517_v17 = vld [vmem:[%s698_s1 + $0x70] sm:$0xff]   ;;  %v415_v18 = vld.sshfl [vmem:[%s697_s0] sm:$0x13 pattern:$0x75316420]  ;;  %v522_v22 = vld [vmem:[%s698_s1 + $0x98] sm:$0xff]  }
   0x7   :  { %446 = vmatpush3.bf16.msra.mxu0 %v506_v4  ;;  %v518_v23 = vld [vmem:[%s698_s1 + $0x30] sm:$0xff]   ;;  %v78_v24 = vcombine.high %v415_v18, %v415_v18 }
   0x8   :  { %447 = vmatprep.subr.bf16.mxu0 %v507_v5  ;;  %478 = vmatpush3.bf16.msra.mxu1 %v516_v11 }
   0x9   :  { %479 = vmatprep.subr.bf16.mxu1 %v555_v2 }
   0xb   :  { %448 = vmatpush3.bf16.msra.mxu0 %v508_v6 }
   0xc   :  { %449 = vmatprep.subr.bf16.mxu0 %v509_v7  ;;  %480 = vmatpush3.bf16.msra.mxu1 %v519_v14 }
   0xd   :  { %481 = vmatprep.subr.bf16.mxu1 %v555_v2 }
   0xf   :  { %450 = vmatpush3.bf16.msra.mxu0 %v510_v9 }
  0x10   :  { %451 = vmatprep.subr.bf16.mxu0 %v511_v10 }
  0x13   :  { %452 = vmatpush3.bf16.msra.mxu0 %v512_v12 }
  0x14   :  { %453 = vmatprep.subr.bf16.mxu0 %v514_v13 }
  0x17   :  { %454 = vmatpush3.bf16.msra.mxu0 %v515_v16 }
  0x18   :  { %10 = vsyncpa [#allocation3], 0  ;;  %455 = vmatprep.subr.bf16.mxu0 %v517_v17  ;;  %v520_v26 = vld [vmem:[%s698_s1 + $0x78] sm:$0xff]   ;;  %v84_v27 = vsub.s32 %v81_v25, %v83_v21  ;;  %482 = vmatpush3.bf16.msra.mxu1 %v522_v22  ;;  %vm216_vm1 = vcmask 523264   ;;  %v523_v31 = vld [vmem:[%s700_s3] sm:$0xff]   ;;  %vm341_vm2 = vcmask 1040384  }
  0x19   :  { %487 = vmatprep.subr.bf16.mxu1 %v555_v2  ;;  %v521_v30 = vld [vmem:[%s698_s1 + $0x38] sm:$0xff]   ;;  %v524_v33 = vld [vmem:[%s700_s3 + $0x8] sm:$0xff]   ;;  %v525_v34 = vld [vmem:[%s700_s3 + $0x10] sm:$0xff]   ;;  %vm337_vm3 = vcmask 408576   ;;  %vm385_vm4 = vcmask 74752  }
  0x1a   :  { %v92_v28 = vrot.slane %v78_v24, %v84_v27  ;;  %v85_v29 = vrot.slane %v415_v18, %v84_v27  ;;  %v526_v35 = vld [vmem:[%s700_s3 + $0x18] ss:$0 sps:$4 sm:$0x11]   ;;  %v414_v43 = vld [vmem:[%s699_s2] ss:$0 sm:$0xff]  ;;  %s558_s2 = smov [#allocation2]  }
  0x1b   :  { %456 = vmatpush3.bf16.msra.mxu0 %v518_v23  ;;  %v343_v36 = vsel %vm341_vm2, %v526_v35, 0  ;;  %v437_v51 = vld [vmem:[%s701_s4] ss:$0 sm:$0xff]  ;;  %s406_s4 = sshll.u32 %s558_s2, 4  ;;  %s407_s4 = int_to_ptr.vmem [resolvable:$true] %s406_s4 }
  0x1c   :  { %457 = vmatprep.subr.bf16.mxu0 %v520_v26  ;;  %252 = vmatprep.mubr.bf16.mxu0 %v92_v28  ;;  %v93_v32 = vcombine.high %v85_v29, %v85_v29  ;;  %s531_s19 = scalar_lea.vmem %s407_s4, 32  ;;  %p536_p1 = scmp.lt.s32.totalorder %s407_s4, %s407_s4 }
  0x1d   :  { %p532_p0 = scmp.ne.s32.totalorder %s407_s4, %s531_s19  ;;  %p537_p2 = scmp.lt.s32.totalorder %s531_s19, %s531_s19 }
  0x1e   :  { %484 = vmatmul.mubr.msk.bf16.vlgmr.msra.gmra.mrb[0].mxu1 %vm216_vm1, %v93_v32 }
  0x1f   :  { %458 = vmatpush3.bf16.msra.mxu0 %v521_v30  ;;  %488 = vmatpush3.bf16.msra.mxu1 %v523_v31  ;;  %p538_p3 = por %p537_p2, %p536_p1 }
  0x20   :  { %489 = vmatprep.subr.bf16.mxu1 %v555_v2  ;;  %495 = vmatprep.mubr.msk.bf16.mxu1 %vm556_vm0, %v555_v2 }
  0x21   :  { %p539_p4 = pnand %p538_p3, %p532_p0 }
  0x22   :  { %253 = vmatmul.mubr.bf16.vlgmr.msra.gmra.mrb[0].mxu0 %v85_v29 }
  0x23   :  { %490 = vmatpush3.bf16.msra.mxu1 %v524_v33 }
  0x24   :  { %491 = vmatprep.subr.bf16.mxu1 %v555_v2 }
  0x27   :  { %492 = vmatpush3.bf16.msra.mxu1 %v525_v34 }
  0x28   :  { %493 = vmatprep.subr.bf16.mxu1 %v555_v2 }
  0x2b   :  { %494 = vmatpush3.bf16.msra.mxu1 %v343_v36 }
  0xf1   :  { %v294_v37 = vpop.f32.mrb[0].mxu1 }
  0xf2   :  { %v485_v38 = vpop.f32.mrb[1].mxu1 }
  0xf3   :  { %v297_v39 = vpop.f32.mrb[2].mxu1 }
  0xf4   :  { %v486_v40 = vpop.f32.mrb[3].mxu1 }
  0xf5   :  { %v459_v41 = vpop.f32.mrb[0].mxu0 }
  0xf6   :  { %v460_v42 = vpop.f32.mrb[1].mxu0 }
  0xf7   :  { %v461_v44 = vadd.f32 %v460_v42, %v459_v41  ;;  %v462_v45 = vpop.f32.mrb[2].mxu0 }
  0xf8   :  { %v463_v46 = vpop.f32.mrb[3].mxu0 }
  0xf9   :  { %v255_v47 = vadd.f32 %v461_v44, %v414_v43 }
  0xfb   :  { %v295_v48 = vadd.f32 %v294_v37, %v255_v47 }
  0xfd   :  { %v300_v49 = vmax.f32 %v295_v48, 0.0 }
  0xff   :  { %v301_v50 = vpack.c.bf16 %v300_v49, %v300_v49 }
 0x101   :  { %496 = vmatmul.mubr.msk.bf16.vlgmr.msra.gmra.mrb[4].mxu1 %vm337_vm3, %v301_v50 }
 0x1d4   :  { %v379_v52 = vpop.f32.mrb[4].mxu1 }
 0x1d5   :  { %v380_v53 = vadd.f32 %v437_v51, %v379_v52  ;;  %v497_v54 = vpop.f32.mrb[5].mxu1 }
 0x1d6   :  { %v382_v55 = vpop.f32.mrb[6].mxu1 }
 0x1d7   :  { %v498_v56 = vpop.f32.mrb[7].mxu1  ;;  %v386_v57 = vsel %vm385_vm4, %v380_v53, -inf }
 0x1d8   :  { %387 = vmax.xlane.f32.xlu0 %v386_v57 }
 0x265   :  { %v388_v58 = vpop.xlane.xlu0 %387 }
 0x266   :  { %v389_v59 = vsub.f32 %v380_v53, %v388_v58 }
 0x268   :  { %v390_v60 = vmul.f32 1.442695, %v389_v59 }
 0x26a   :  { %527 = vpow2.f32 %v390_v60 }
 0x274   :  { %v528_v61 = vpop.eup %527 }
 0x275   :  { %v392_v62 = vsel %vm385_vm4, %v528_v61, 0.0 }
 0x276   :  { %393 = vadd.xlane.f32.xlu0 %v392_v62 }
 0x303   :  { %v394_v63 = vpop.xlane.xlu0 %393 }
 0x304   :  { %529 = vlog2.f32 %v394_v63 }
 0x30e   :  { %v530_v0 = vpop.eup %529 }
 0x30f   :  { %v396_v1 = vmul.f32 0.6931472, %v530_v0 }
 0x311   :  { %v397_v2 = vadd.f32 %v396_v1, %v388_v58 }
 0x313   :  { %v398_v3 = vsub.f32 %v380_v53, %v397_v2 }
 0x315   :  { %399 = vst.msk [vmem:[#allocation2] sm:$0x3] %vm385_vm4, %v398_v3 }
 0x316   :  { %542 = shalt.err (!%p539_p4)
}
 0x317   :  { %s543_s22 = scalar_lea.hbm %s702_s5, 32 }
 0x318   :  { %p544_p5 = scmp.ne.s32.totalorder %s702_s5, %s543_s22  ;;  %p547_p6 = scmp.lt.u32.totalorder %s543_s22, %s702_s5 }
 0x31a   :  { %p549_p7 = pnand %p547_p6, %p544_p5 }
 0x31c   :  { %552 = shalt.err (!%p549_p7)
}
 0x31d   :  { %409 = dma.vmem_to_hbm [thread:$0]  %s407_s4, 32, %s702_s5, [#allocation3]  }
 0x31e   :  { %553 = dma.done.wait [#allocation3], 32  }
 0x31f   :  { %554 = vsyncadd [#allocation3], 4294967264 }
 0x320   :  { %413 = vsyncpa [#allocation3], 1 }

</bundles_post_ra>
